<compile_context>
chip_gen: v6e
topology: v6e:2x2x1
jax: 0.10.0
libtpu: 0.0.40
codegen_flags: <defaults>
</compile_context>

<pallas_src>
import jax
import jax.numpy as jnp
from jax.experimental import pallas as pl
from jax.experimental.pallas import tpu as pltpu

S = 50    # sequence length (hard-coded by the torch module's reshape(b, 50, 4, 8))
D = 32    # model dim
H = 4     # heads
DH = 8    # head dim
FF = 64   # FFN hidden dim
L = 3     # encoder layers

W_ROWS = 4 * D + FF   # 192 rows in the packed weight slab
W_COLS = H * D        # 128 cols (widest weight: block-diagonal Wo)
B_ROWS = 8            # bias/LN rows per layer
B_COLS = 2 * D        # 64 cols (widest bias: fused [bq|bv] and b1)


def _layernorm(x, w, b, eps=1e-5):
    mu = jnp.mean(x, axis=-1, keepdims=True)
    var = jnp.mean((x - mu) ** 2, axis=-1, keepdims=True)
    return (x - mu) * jax.lax.rsqrt(var + eps) * w + b


def encoder_kernel(x_ref, amask_ref, w_ref, b_ref, o_ref):
    x0 = x_ref[0].astype(jnp.float32)          # (S, D)
    amask = amask_ref[0, 0]                    # (S, S) additive mask (0 / -1e30)

    def layer(l, x):
        # ---- MultiHead (pre-norm) ----
        xn = _layernorm(x, b_ref[l, 0:1, 0:D], b_ref[l, 1:2, 0:D])

        # Fused Q/V projection (1/sqrt(DH) already folded into the Q half).
        qv = jnp.dot(xn, w_ref[l, 0:D, 0:2 * D],
                     preferred_element_type=jnp.float32) + b_ref[l, 2:3, 0:2 * D]
        q = qv[:, 0:D]
        v = qv[:, D:2 * D]

        # K^T via host-pre-transposed Wk^T: one (S,D)->(D,S) transpose per layer;
        # per-head slices below are sublane-aligned.  K bias dropped (it adds a
        # per-query-row constant to the scores -> softmax-invariant).
        kT = jnp.dot(w_ref[l, D:2 * D, 0:D], xn.T,
                     preferred_element_type=jnp.float32)             # (D, S)

        # All 4 head output projections in one K=32 / N=128 MXU push against
        # the block-diagonal Wo; vo[:, 32h:32h+32] == v_h @ Wo[8h:8h+8, :].
        vo = jnp.dot(v, w_ref[l, 2 * D:3 * D, :],
                     preferred_element_type=jnp.float32)             # (S, H*D)

        attn = jnp.zeros((S, D), jnp.float32)
        for h in range(H):                                           # static head loop
            qh = q[:, h * DH:(h + 1) * DH]                           # (S, DH)
            khT = kT[h * DH:(h + 1) * DH, :]                         # (DH, S)
            s = jnp.dot(qh, khT, preferred_element_type=jnp.float32) + amask
            e = jnp.exp(s - jnp.max(s, axis=-1, keepdims=True))
            pv = jnp.dot(e, vo[:, h * D:(h + 1) * D],
                         preferred_element_type=jnp.float32)         # (S, D)
            inv = pl.reciprocal(jnp.sum(e, axis=-1, keepdims=True), approx=True)
            attn = attn + pv * inv
        # Dropout(p=0.1) -> identity at inference.
        x1 = x + attn + b_ref[l, 3:4, 0:D]

        # ---- FullyConnectedOutput (pre-norm FFN + residual) ----
        x1n = _layernorm(x1, b_ref[l, 4:5, 0:D], b_ref[l, 5:6, 0:D])
        h1 = jnp.maximum(
            jnp.dot(x1n, w_ref[l, 3 * D:4 * D, 0:FF],
                    preferred_element_type=jnp.float32) + b_ref[l, 6:7, 0:FF], 0.0)
        h2 = jnp.dot(h1, w_ref[l, 4 * D:4 * D + FF, 0:D],
                     preferred_element_type=jnp.float32) + b_ref[l, 7:8, 0:D]
        return x1 + h2

    x = jax.lax.fori_loop(0, L, layer, x0)
    o_ref[0] = x.astype(o_ref.dtype)


def prepare_packed_params(all_params):
    """Pack the 12 per-layer parameter arrays into two contiguous slabs.

    wslab (L, 192, 128), row bands (all column slices start at lane 0):
        rows   0: 32, cols 0: 64  -> [Wq * 1/sqrt(DH) | Wv]   (fused Q/V weight)
        rows  32: 64, cols 0: 32  -> Wk^T                      (pre-transposed)
        rows  64: 96, cols 0:128  -> block-diagonal Wo
        rows  96:128, cols 0: 64  -> W1 (FFN in)
        rows 128:192, cols 0: 32  -> W2 (FFN out)
    bslab (L, 8, 64), rows: ln1w, ln1b, [bq*scale | bv], bo, ln2w, ln2b, b1, b2.
    The K bias is dropped (softmax-invariant per-row constant)."""
    scale = 1.0 / (DH ** 0.5)
    w_layers, b_layers = [], []
    for p in all_params:
        w = jnp.zeros((W_ROWS, W_COLS), jnp.float32)
        w = w.at[0:D, 0:2 * D].set(jnp.concatenate([p["wq"] * scale, p["wv"]], axis=1))
        w = w.at[D:2 * D, 0:D].set(p["wk"].T)
        wo_bd = jnp.zeros((D, H * D), jnp.float32)
        for h in range(H):
            wo_bd = wo_bd.at[h * DH:(h + 1) * DH, h * D:(h + 1) * D].set(
                p["wo"][h * DH:(h + 1) * DH, :])
        w = w.at[2 * D:3 * D, :].set(wo_bd)
        w = w.at[3 * D:4 * D, 0:FF].set(p["w1"])
        w = w.at[4 * D:4 * D + FF, 0:D].set(p["w2"])
        w_layers.append(w)

        bia = jnp.zeros((B_ROWS, B_COLS), jnp.float32)
        bia = bia.at[0, 0:D].set(p["ln1w"][0])
        bia = bia.at[1, 0:D].set(p["ln1b"][0])
        bia = bia.at[2, 0:2 * D].set(
            jnp.concatenate([p["bq"][0] * scale, p["bv"][0]], axis=0))
        bia = bia.at[3, 0:D].set(p["bo"][0])
        bia = bia.at[4, 0:D].set(p["ln2w"][0])
        bia = bia.at[5, 0:D].set(p["ln2b"][0])
        bia = bia.at[6, 0:FF].set(p["b1"][0])
        bia = bia.at[7, 0:D].set(p["b2"][0])
        b_layers.append(bia)
    return jnp.stack(w_layers, axis=0), jnp.stack(b_layers, axis=0)


def encoder_forward(x, mask, all_params):
    b, s, d = x.shape
    wslab, bslab = prepare_packed_params(all_params)
    # Additive mask precomputed once in the wrapper (kernel just adds it).
    amask = jnp.where(mask != 0, jnp.float32(-1e30), jnp.float32(0.0))

    return pl.pallas_call(
        encoder_kernel,
        out_shape=jax.ShapeDtypeStruct((b, s, d), x.dtype),
        grid_spec=pltpu.PrefetchScalarGridSpec(
            num_scalar_prefetch=0,
            grid=(b,),
            in_specs=[
                pl.BlockSpec((1, s, d), lambda i: (i, 0, 0)),
                pl.BlockSpec((1, 1, s, s), lambda i: (i, 0, 0, 0)),
                # Full-array blocks, constant index -> resident across grid steps.
                pl.BlockSpec(wslab.shape, lambda i: (0, 0, 0)),
                pl.BlockSpec(bslab.shape, lambda i: (0, 0, 0)),
            ],
            out_specs=pl.BlockSpec((1, s, d), lambda i: (i, 0, 0))),
        compiler_params=pltpu.CompilerParams(
            dimension_semantics=("parallel",)),   # v7x: one batch elem per TC
    )(x, amask, wslab, bslab)


# ---------------- deterministic parameter init ----------------
def init_layer_params(key):
    ks = jax.random.split(key, 10)
    f32 = jnp.float32
    return {
        "ln1w": jnp.ones((1, D), f32),
        "ln1b": jnp.zeros((1, D), f32),
        "wq": jax.random.normal(ks[0], (D, D), f32) / D ** 0.5,
        "bq": jax.random.normal(ks[1], (1, D), f32) * 0.02,
        "wk": jax.random.normal(ks[2], (D, D), f32) / D ** 0.5,
        "bk": jax.random.normal(ks[3], (1, D), f32) * 0.02,
        "wv": jax.random.normal(ks[4], (D, D), f32) / D ** 0.5,
        "bv": jax.random.normal(ks[5], (1, D), f32) * 0.02,
        "wo": jax.random.normal(ks[6], (D, D), f32) / D ** 0.5,
        "bo": jax.random.normal(ks[7], (1, D), f32) * 0.02,
        "ln2w": jnp.ones((1, D), f32),
        "ln2b": jnp.zeros((1, D), f32),
        "w1": jax.random.normal(ks[8], (D, FF), f32) / D ** 0.5,
        "b1": jnp.zeros((1, FF), f32),
        "w2": jax.random.normal(ks[9], (FF, D), f32) / FF ** 0.5,
        "b2": jnp.zeros((1, D), f32),
    }


# ---------------- pure-JAX reference for verification ----------------
def _ln_ref(x, w, b, eps=1e-5):
    mu = x.mean(-1, keepdims=True)
    var = ((x - mu) ** 2).mean(-1, keepdims=True)
    return (x - mu) / jnp.sqrt(var + eps) * w + b


def encoder_layer_ref(x, mask, p):
    b, s, d = x.shape
    xn = _ln_ref(x, p["ln1w"][0], p["ln1b"][0])
    q = xn @ p["wq"] + p["bq"]
    k = xn @ p["wk"] + p["bk"]
    v = xn @ p["wv"] + p["bv"]
    q = q.reshape(b, s, H, DH).transpose(0, 2, 1, 3)
    k = k.reshape(b, s, H, DH).transpose(0, 2, 1, 3)
    v = v.reshape(b, s, H, DH).transpose(0, 2, 1, 3)
    sc = jnp.einsum("bhqd,bhkd->bhqk", q, k) / (DH ** 0.5)
    sc = jnp.where(mask != 0, -jnp.inf, sc)
    sc = jax.nn.softmax(sc, axis=-1)
    o = jnp.einsum("bhqk,bhkd->bhqd", sc, v)
    o = o.transpose(0, 2, 1, 3).reshape(b, s, d)
    o = o @ p["wo"] + p["bo"]
    x1 = x + o
    x1n = _ln_ref(x1, p["ln2w"][0], p["ln2b"][0])
    h = jax.nn.relu(x1n @ p["w1"] + p["b1"])
    h = h @ p["w2"] + p["b2"]
    return x1 + h


def encoder_ref(x, mask, all_params):
    for lp in all_params:
        x = encoder_layer_ref(x, mask, lp)
    return x


if __name__ == "__main__":
    key = jax.random.PRNGKey(0)
    kx, k1, k2, k3 = jax.random.split(key, 4)

    B = 2
    x = jax.random.normal(kx, (B, S, D), jnp.float32)
    mask = jnp.zeros((B, 1, S, S), jnp.float32)   # all-zero mask, like torch.zeros(...)

    all_params = [init_layer_params(k1), init_layer_params(k2), init_layer_params(k3)]

    out = encoder_forward(x, mask, all_params)
    out = jax.block_until_ready(out)

    ref = jax.block_until_ready(encoder_ref(x, mask, all_params))
    assert out.shape == (B, S, D)
    assert jnp.allclose(out, ref, atol=1e-2, rtol=1e-2), float(jnp.max(jnp.abs(out - ref)))

    print("KERNEL_OK")
</pallas_src>

<mosaic_0001>
module attributes {stable_mosaic.version = 11 : i64} {
  func.func @encoder_kernel(%arg0: i32, %arg1: memref<1x50x32xf32, #tpu.memory_space<vmem>>, %arg2: memref<1x1x50x50xf32, #tpu.memory_space<vmem>>, %arg3: memref<3x192x128xf32, #tpu.memory_space<vmem>>, %arg4: memref<3x8x64xf32, #tpu.memory_space<vmem>>, %arg5: memref<1x50x32xf32, #tpu.memory_space<vmem>>) attributes {dimension_semantics = [#tpu.dimension_semantics<parallel>], iteration_bounds = array<i64: 2>, scalar_prefetch = 0 : i64, scratch_operands = 0 : i64, tpu.core_type = #tpu.core_type<tc>, window_params = [{transform_indices = @transform_0, window_bounds = array<i64: 1, 50, 32>}, {transform_indices = @transform_1, window_bounds = array<i64: 1, 1, 50, 50>}, {pipeline_mode = #tpu.pipeline_mode<synchronous>, transform_indices = @transform_2, window_bounds = array<i64: 3, 192, 128>}, {pipeline_mode = #tpu.pipeline_mode<synchronous>, transform_indices = @transform_3, window_bounds = array<i64: 3, 8, 64>}, {transform_indices = @transform_4, window_bounds = array<i64: 1, 50, 32>}]} {
    %c0 = arith.constant 0 : index
    %c0_0 = arith.constant 0 : index
    %c0_1 = arith.constant 0 : index
    %0 = vector.load %arg1[%c0, %c0_0, %c0_1] : memref<1x50x32xf32, #tpu.memory_space<vmem>>, vector<1x50x32xf32>
    %1 = vector.shape_cast %0 : vector<1x50x32xf32> to vector<50x32xf32>
    %c0_2 = arith.constant 0 : index
    %c0_3 = arith.constant 0 : index
    %c0_4 = arith.constant 0 : index
    %c0_5 = arith.constant 0 : index
    %2 = vector.load %arg2[%c0_2, %c0_3, %c0_4, %c0_5] : memref<1x1x50x50xf32, #tpu.memory_space<vmem>>, vector<1x1x50x50xf32>
    %3 = vector.shape_cast %2 : vector<1x1x50x50xf32> to vector<50x50xf32>
    %c0_i32 = arith.constant 0 : i32
    %c3_i32 = arith.constant 3 : i32
    %4 = arith.addi %c0_i32, %c3_i32 : i32
    %c1_i32 = arith.constant 1 : i32
    %5 = scf.for %arg6 = %c0_i32 to %4 step %c1_i32 iter_args(%arg7 = %1) -> (vector<50x32xf32>)  : i32 {
      %9 = arith.index_cast %arg6 : i32 to index
      %c0_10 = arith.constant 0 : index
      %c0_11 = arith.constant 0 : index
      %10 = vector.load %arg4[%9, %c0_10, %c0_11] : memref<3x8x64xf32, #tpu.memory_space<vmem>>, vector<1x1x32xf32>
      %11 = vector.shape_cast %10 : vector<1x1x32xf32> to vector<1x32xf32>
      %12 = arith.index_cast %arg6 : i32 to index
      %c1 = arith.constant 1 : index
      %c0_12 = arith.constant 0 : index
      %13 = vector.load %arg4[%12, %c1, %c0_12] : memref<3x8x64xf32, #tpu.memory_space<vmem>>, vector<1x1x32xf32>
      %14 = vector.shape_cast %13 : vector<1x1x32xf32> to vector<1x32xf32>
      %cst = arith.constant dense<0.000000e+00> : vector<50xf32>
      %15 = vector.multi_reduction <add>, %arg7, %cst [1] : vector<50x32xf32> to vector<50xf32>
      %16 = vector.shape_cast %15 : vector<50xf32> to vector<50x1xf32>
      %cst_13 = arith.constant 3.200000e+01 : f32
      %17 = vector.broadcast %cst_13 : f32 to vector<50x1xf32>
      %18 = arith.divf %16, %17 : vector<50x1xf32>
      %19 = vector.broadcast %18 : vector<50x1xf32> to vector<50x32xf32>
      %20 = arith.subf %arg7, %19 : vector<50x32xf32>
      %21 = arith.mulf %20, %20 : vector<50x32xf32>
      %cst_14 = arith.constant dense<0.000000e+00> : vector<50xf32>
      %22 = vector.multi_reduction <add>, %21, %cst_14 [1] : vector<50x32xf32> to vector<50xf32>
      %23 = vector.shape_cast %22 : vector<50xf32> to vector<50x1xf32>
      %cst_15 = arith.constant 3.200000e+01 : f32
      %24 = vector.broadcast %cst_15 : f32 to vector<50x1xf32>
      %25 = arith.divf %23, %24 : vector<50x1xf32>
      %26 = vector.broadcast %18 : vector<50x1xf32> to vector<50x32xf32>
      %27 = arith.subf %arg7, %26 : vector<50x32xf32>
      %cst_16 = arith.constant 9.99999974E-6 : f32
      %28 = vector.broadcast %cst_16 : f32 to vector<50x1xf32>
      %29 = arith.addf %25, %28 : vector<50x1xf32>
      %30 = math.rsqrt %29 : vector<50x1xf32>
      %31 = vector.broadcast %30 : vector<50x1xf32> to vector<50x32xf32>
      %32 = arith.mulf %27, %31 : vector<50x32xf32>
      %33 = vector.broadcast %11 : vector<1x32xf32> to vector<50x32xf32>
      %34 = arith.mulf %32, %33 : vector<50x32xf32>
      %35 = vector.broadcast %14 : vector<1x32xf32> to vector<50x32xf32>
      %36 = arith.addf %34, %35 : vector<50x32xf32>
      %37 = arith.index_cast %arg6 : i32 to index
      %c0_17 = arith.constant 0 : index
      %c0_18 = arith.constant 0 : index
      %38 = vector.load %arg3[%37, %c0_17, %c0_18] : memref<3x192x128xf32, #tpu.memory_space<vmem>>, vector<1x32x64xf32>
      %39 = vector.shape_cast %38 : vector<1x32x64xf32> to vector<32x64xf32>
      %cst_19 = arith.constant dense<0.000000e+00> : vector<50x64xf32>
      %40 = tpu.matmul %36, %39, %cst_19 {dimension_numbers = #tpu.dot_dimension_numbers<[1], [0], [0], [1], [0, 0, 1, 1], [], []>} : vector<50x32xf32>, vector<32x64xf32>, vector<50x64xf32> -> vector<50x64xf32>
      %41 = arith.index_cast %arg6 : i32 to index
      %c2 = arith.constant 2 : index
      %c0_20 = arith.constant 0 : index
      %42 = vector.load %arg4[%41, %c2, %c0_20] : memref<3x8x64xf32, #tpu.memory_space<vmem>>, vector<1x1x64xf32>
      %43 = vector.shape_cast %42 : vector<1x1x64xf32> to vector<1x64xf32>
      %44 = vector.broadcast %43 : vector<1x64xf32> to vector<50x64xf32>
      %45 = arith.addf %40, %44 : vector<50x64xf32>
      %46 = vector.extract_strided_slice %45 {offsets = [0, 0], sizes = [50, 32], strides = [1, 1]} : vector<50x64xf32> to vector<50x32xf32>
      %47 = vector.extract_strided_slice %45 {offsets = [0, 32], sizes = [50, 32], strides = [1, 1]} : vector<50x64xf32> to vector<50x32xf32>
      %48 = arith.index_cast %arg6 : i32 to index
      %c32 = arith.constant 32 : index
      %c0_21 = arith.constant 0 : index
      %49 = vector.load %arg3[%48, %c32, %c0_21] : memref<3x192x128xf32, #tpu.memory_space<vmem>>, vector<1x32x32xf32>
      %50 = vector.shape_cast %49 : vector<1x32x32xf32> to vector<32x32xf32>
      %51 = tpu.transpose %36, [1, 0] : vector<50x32xf32> -> vector<32x50xf32>
      %cst_22 = arith.constant dense<0.000000e+00> : vector<32x50xf32>
      %52 = tpu.matmul %50, %51, %cst_22 {dimension_numbers = #tpu.dot_dimension_numbers<[1], [0], [0], [1], [0, 0, 1, 1], [], []>} : vector<32x32xf32>, vector<32x50xf32>, vector<32x50xf32> -> vector<32x50xf32>
      %53 = arith.index_cast %arg6 : i32 to index
      %c64 = arith.constant 64 : index
      %c0_23 = arith.constant 0 : index
      %54 = vector.load %arg3[%53, %c64, %c0_23] : memref<3x192x128xf32, #tpu.memory_space<vmem>>, vector<1x32x128xf32>
      %55 = vector.shape_cast %54 : vector<1x32x128xf32> to vector<32x128xf32>
      %cst_24 = arith.constant dense<0.000000e+00> : vector<50x128xf32>
      %56 = tpu.matmul %47, %55, %cst_24 {dimension_numbers = #tpu.dot_dimension_numbers<[1], [0], [0], [1], [0, 0, 1, 1], [], []>} : vector<50x32xf32>, vector<32x128xf32>, vector<50x128xf32> -> vector<50x128xf32>
      %cst_25 = arith.constant 0.000000e+00 : f32
      %57 = vector.broadcast %cst_25 : f32 to vector<50x32xf32>
      %58 = vector.extract_strided_slice %46 {offsets = [0, 0], sizes = [50, 8], strides = [1, 1]} : vector<50x32xf32> to vector<50x8xf32>
      %59 = vector.extract_strided_slice %52 {offsets = [0, 0], sizes = [8, 50], strides = [1, 1]} : vector<32x50xf32> to vector<8x50xf32>
      %cst_26 = arith.constant dense<0.000000e+00> : vector<50x50xf32>
      %60 = tpu.matmul %58, %59, %cst_26 {dimension_numbers = #tpu.dot_dimension_numbers<[1], [0], [0], [1], [0, 0, 1, 1], [], []>} : vector<50x8xf32>, vector<8x50xf32>, vector<50x50xf32> -> vector<50x50xf32>
      %61 = arith.addf %60, %3 : vector<50x50xf32>
      %cst_27 = arith.constant dense<0xFF800000> : vector<50xf32>
      %62 = vector.multi_reduction <maximumf>, %61, %cst_27 [1] : vector<50x50xf32> to vector<50xf32>
      %63 = vector.shape_cast %62 : vector<50xf32> to vector<50x1xf32>
      %64 = vector.broadcast %63 : vector<50x1xf32> to vector<50x50xf32>
      %65 = arith.subf %61, %64 : vector<50x50xf32>
      %66 = math.exp %65 : vector<50x50xf32>
      %67 = vector.extract_strided_slice %56 {offsets = [0, 0], sizes = [50, 32], strides = [1, 1]} : vector<50x128xf32> to vector<50x32xf32>
      %cst_28 = arith.constant dense<0.000000e+00> : vector<50x32xf32>
      %68 = tpu.matmul %66, %67, %cst_28 {dimension_numbers = #tpu.dot_dimension_numbers<[1], [0], [0], [1], [0, 0, 1, 1], [], []>} : vector<50x50xf32>, vector<50x32xf32>, vector<50x32xf32> -> vector<50x32xf32>
      %cst_29 = arith.constant dense<0.000000e+00> : vector<50xf32>
      %69 = vector.multi_reduction <add>, %66, %cst_29 [1] : vector<50x50xf32> to vector<50xf32>
      %70 = vector.shape_cast %69 : vector<50xf32> to vector<50x1xf32>
      %71 = tpu.reciprocal %70 {approx = true} : vector<50x1xf32> -> vector<50x1xf32>
      %72 = vector.broadcast %71 : vector<50x1xf32> to vector<50x32xf32>
      %73 = arith.mulf %68, %72 : vector<50x32xf32>
      %74 = arith.addf %57, %73 : vector<50x32xf32>
      %75 = vector.extract_strided_slice %46 {offsets = [0, 8], sizes = [50, 8], strides = [1, 1]} : vector<50x32xf32> to vector<50x8xf32>
      %76 = vector.extract_strided_slice %52 {offsets = [8, 0], sizes = [8, 50], strides = [1, 1]} : vector<32x50xf32> to vector<8x50xf32>
      %cst_30 = arith.constant dense<0.000000e+00> : vector<50x50xf32>
      %77 = tpu.matmul %75, %76, %cst_30 {dimension_numbers = #tpu.dot_dimension_numbers<[1], [0], [0], [1], [0, 0, 1, 1], [], []>} : vector<50x8xf32>, vector<8x50xf32>, vector<50x50xf32> -> vector<50x50xf32>
      %78 = arith.addf %77, %3 : vector<50x50xf32>
      %cst_31 = arith.constant dense<0xFF800000> : vector<50xf32>
      %79 = vector.multi_reduction <maximumf>, %78, %cst_31 [1] : vector<50x50xf32> to vector<50xf32>
      %80 = vector.shape_cast %79 : vector<50xf32> to vector<50x1xf32>
      %81 = vector.broadcast %80 : vector<50x1xf32> to vector<50x50xf32>
      %82 = arith.subf %78, %81 : vector<50x50xf32>
      %83 = math.exp %82 : vector<50x50xf32>
      %84 = vector.extract_strided_slice %56 {offsets = [0, 32], sizes = [50, 32], strides = [1, 1]} : vector<50x128xf32> to vector<50x32xf32>
      %cst_32 = arith.constant dense<0.000000e+00> : vector<50x32xf32>
      %85 = tpu.matmul %83, %84, %cst_32 {dimension_numbers = #tpu.dot_dimension_numbers<[1], [0], [0], [1], [0, 0, 1, 1], [], []>} : vector<50x50xf32>, vector<50x32xf32>, vector<50x32xf32> -> vector<50x32xf32>
      %cst_33 = arith.constant dense<0.000000e+00> : vector<50xf32>
      %86 = vector.multi_reduction <add>, %83, %cst_33 [1] : vector<50x50xf32> to vector<50xf32>
      %87 = vector.shape_cast %86 : vector<50xf32> to vector<50x1xf32>
      %88 = tpu.reciprocal %87 {approx = true} : vector<50x1xf32> -> vector<50x1xf32>
      %89 = vector.broadcast %88 : vector<50x1xf32> to vector<50x32xf32>
      %90 = arith.mulf %85, %89 : vector<50x32xf32>
      %91 = arith.addf %74, %90 : vector<50x32xf32>
      %92 = vector.extract_strided_slice %46 {offsets = [0, 16], sizes = [50, 8], strides = [1, 1]} : vector<50x32xf32> to vector<50x8xf32>
      %93 = vector.extract_strided_slice %52 {offsets = [16, 0], sizes = [8, 50], strides = [1, 1]} : vector<32x50xf32> to vector<8x50xf32>
      %cst_34 = arith.constant dense<0.000000e+00> : vector<50x50xf32>
      %94 = tpu.matmul %92, %93, %cst_34 {dimension_numbers = #tpu.dot_dimension_numbers<[1], [0], [0], [1], [0, 0, 1, 1], [], []>} : vector<50x8xf32>, vector<8x50xf32>, vector<50x50xf32> -> vector<50x50xf32>
      %95 = arith.addf %94, %3 : vector<50x50xf32>
      %cst_35 = arith.constant dense<0xFF800000> : vector<50xf32>
      %96 = vector.multi_reduction <maximumf>, %95, %cst_35 [1] : vector<50x50xf32> to vector<50xf32>
      %97 = vector.shape_cast %96 : vector<50xf32> to vector<50x1xf32>
      %98 = vector.broadcast %97 : vector<50x1xf32> to vector<50x50xf32>
      %99 = arith.subf %95, %98 : vector<50x50xf32>
      %100 = math.exp %99 : vector<50x50xf32>
      %101 = vector.extract_strided_slice %56 {offsets = [0, 64], sizes = [50, 32], strides = [1, 1]} : vector<50x128xf32> to vector<50x32xf32>
      %cst_36 = arith.constant dense<0.000000e+00> : vector<50x32xf32>
      %102 = tpu.matmul %100, %101, %cst_36 {dimension_numbers = #tpu.dot_dimension_numbers<[1], [0], [0], [1], [0, 0, 1, 1], [], []>} : vector<50x50xf32>, vector<50x32xf32>, vector<50x32xf32> -> vector<50x32xf32>
      %cst_37 = arith.constant dense<0.000000e+00> : vector<50xf32>
      %103 = vector.multi_reduction <add>, %100, %cst_37 [1] : vector<50x50xf32> to vector<50xf32>
      %104 = vector.shape_cast %103 : vector<50xf32> to vector<50x1xf32>
      %105 = tpu.reciprocal %104 {approx = true} : vector<50x1xf32> -> vector<50x1xf32>
      %106 = vector.broadcast %105 : vector<50x1xf32> to vector<50x32xf32>
      %107 = arith.mulf %102, %106 : vector<50x32xf32>
      %108 = arith.addf %91, %107 : vector<50x32xf32>
      %109 = vector.extract_strided_slice %46 {offsets = [0, 24], sizes = [50, 8], strides = [1, 1]} : vector<50x32xf32> to vector<50x8xf32>
      %110 = vector.extract_strided_slice %52 {offsets = [24, 0], sizes = [8, 50], strides = [1, 1]} : vector<32x50xf32> to vector<8x50xf32>
      %cst_38 = arith.constant dense<0.000000e+00> : vector<50x50xf32>
      %111 = tpu.matmul %109, %110, %cst_38 {dimension_numbers = #tpu.dot_dimension_numbers<[1], [0], [0], [1], [0, 0, 1, 1], [], []>} : vector<50x8xf32>, vector<8x50xf32>, vector<50x50xf32> -> vector<50x50xf32>
      %112 = arith.addf %111, %3 : vector<50x50xf32>
      %cst_39 = arith.constant dense<0xFF800000> : vector<50xf32>
      %113 = vector.multi_reduction <maximumf>, %112, %cst_39 [1] : vector<50x50xf32> to vector<50xf32>
      %114 = vector.shape_cast %113 : vector<50xf32> to vector<50x1xf32>
      %115 = vector.broadcast %114 : vector<50x1xf32> to vector<50x50xf32>
      %116 = arith.subf %112, %115 : vector<50x50xf32>
      %117 = math.exp %116 : vector<50x50xf32>
      %118 = vector.extract_strided_slice %56 {offsets = [0, 96], sizes = [50, 32], strides = [1, 1]} : vector<50x128xf32> to vector<50x32xf32>
      %cst_40 = arith.constant dense<0.000000e+00> : vector<50x32xf32>
      %119 = tpu.matmul %117, %118, %cst_40 {dimension_numbers = #tpu.dot_dimension_numbers<[1], [0], [0], [1], [0, 0, 1, 1], [], []>} : vector<50x50xf32>, vector<50x32xf32>, vector<50x32xf32> -> vector<50x32xf32>
      %cst_41 = arith.constant dense<0.000000e+00> : vector<50xf32>
      %120 = vector.multi_reduction <add>, %117, %cst_41 [1] : vector<50x50xf32> to vector<50xf32>
      %121 = vector.shape_cast %120 : vector<50xf32> to vector<50x1xf32>
      %122 = tpu.reciprocal %121 {approx = true} : vector<50x1xf32> -> vector<50x1xf32>
      %123 = vector.broadcast %122 : vector<50x1xf32> to vector<50x32xf32>
      %124 = arith.mulf %119, %123 : vector<50x32xf32>
      %125 = arith.addf %108, %124 : vector<50x32xf32>
      %126 = arith.addf %arg7, %125 : vector<50x32xf32>
      %127 = arith.index_cast %arg6 : i32 to index
      %c3 = arith.constant 3 : index
      %c0_42 = arith.constant 0 : index
      %128 = vector.load %arg4[%127, %c3, %c0_42] : memref<3x8x64xf32, #tpu.memory_space<vmem>>, vector<1x1x32xf32>
      %129 = vector.shape_cast %128 : vector<1x1x32xf32> to vector<1x32xf32>
      %130 = vector.broadcast %129 : vector<1x32xf32> to vector<50x32xf32>
      %131 = arith.addf %126, %130 : vector<50x32xf32>
      %132 = arith.index_cast %arg6 : i32 to index
      %c4 = arith.constant 4 : index
      %c0_43 = arith.constant 0 : index
      %133 = vector.load %arg4[%132, %c4, %c0_43] : memref<3x8x64xf32, #tpu.memory_space<vmem>>, vector<1x1x32xf32>
      %134 = vector.shape_cast %133 : vector<1x1x32xf32> to vector<1x32xf32>
      %135 = arith.index_cast %arg6 : i32 to index
      %c5 = arith.constant 5 : index
      %c0_44 = arith.constant 0 : index
      %136 = vector.load %arg4[%135, %c5, %c0_44] : memref<3x8x64xf32, #tpu.memory_space<vmem>>, vector<1x1x32xf32>
      %137 = vector.shape_cast %136 : vector<1x1x32xf32> to vector<1x32xf32>
      %cst_45 = arith.constant dense<0.000000e+00> : vector<50xf32>
      %138 = vector.multi_reduction <add>, %131, %cst_45 [1] : vector<50x32xf32> to vector<50xf32>
      %139 = vector.shape_cast %138 : vector<50xf32> to vector<50x1xf32>
      %cst_46 = arith.constant 3.200000e+01 : f32
      %140 = vector.broadcast %cst_46 : f32 to vector<50x1xf32>
      %141 = arith.divf %139, %140 : vector<50x1xf32>
      %142 = vector.broadcast %141 : vector<50x1xf32> to vector<50x32xf32>
      %143 = arith.subf %131, %142 : vector<50x32xf32>
      %144 = arith.mulf %143, %143 : vector<50x32xf32>
      %cst_47 = arith.constant dense<0.000000e+00> : vector<50xf32>
      %145 = vector.multi_reduction <add>, %144, %cst_47 [1] : vector<50x32xf32> to vector<50xf32>
      %146 = vector.shape_cast %145 : vector<50xf32> to vector<50x1xf32>
      %cst_48 = arith.constant 3.200000e+01 : f32
      %147 = vector.broadcast %cst_48 : f32 to vector<50x1xf32>
      %148 = arith.divf %146, %147 : vector<50x1xf32>
      %149 = vector.broadcast %141 : vector<50x1xf32> to vector<50x32xf32>
      %150 = arith.subf %131, %149 : vector<50x32xf32>
      %cst_49 = arith.constant 9.99999974E-6 : f32
      %151 = vector.broadcast %cst_49 : f32 to vector<50x1xf32>
      %152 = arith.addf %148, %151 : vector<50x1xf32>
      %153 = math.rsqrt %152 : vector<50x1xf32>
      %154 = vector.broadcast %153 : vector<50x1xf32> to vector<50x32xf32>
      %155 = arith.mulf %150, %154 : vector<50x32xf32>
      %156 = vector.broadcast %134 : vector<1x32xf32> to vector<50x32xf32>
      %157 = arith.mulf %155, %156 : vector<50x32xf32>
      %158 = vector.broadcast %137 : vector<1x32xf32> to vector<50x32xf32>
      %159 = arith.addf %157, %158 : vector<50x32xf32>
      %160 = arith.index_cast %arg6 : i32 to index
      %c96 = arith.constant 96 : index
      %c0_50 = arith.constant 0 : index
      %161 = vector.load %arg3[%160, %c96, %c0_50] : memref<3x192x128xf32, #tpu.memory_space<vmem>>, vector<1x32x64xf32>
      %162 = vector.shape_cast %161 : vector<1x32x64xf32> to vector<32x64xf32>
      %cst_51 = arith.constant dense<0.000000e+00> : vector<50x64xf32>
      %163 = tpu.matmul %159, %162, %cst_51 {dimension_numbers = #tpu.dot_dimension_numbers<[1], [0], [0], [1], [0, 0, 1, 1], [], []>} : vector<50x32xf32>, vector<32x64xf32>, vector<50x64xf32> -> vector<50x64xf32>
      %164 = arith.index_cast %arg6 : i32 to index
      %c6 = arith.constant 6 : index
      %c0_52 = arith.constant 0 : index
      %165 = vector.load %arg4[%164, %c6, %c0_52] : memref<3x8x64xf32, #tpu.memory_space<vmem>>, vector<1x1x64xf32>
      %166 = vector.shape_cast %165 : vector<1x1x64xf32> to vector<1x64xf32>
      %167 = vector.broadcast %166 : vector<1x64xf32> to vector<50x64xf32>
      %168 = arith.addf %163, %167 : vector<50x64xf32>
      %cst_53 = arith.constant 0.000000e+00 : f32
      %169 = vector.broadcast %cst_53 : f32 to vector<50x64xf32>
      %170 = arith.maximumf %168, %169 : vector<50x64xf32>
      %171 = arith.index_cast %arg6 : i32 to index
      %c128 = arith.constant 128 : index
      %c0_54 = arith.constant 0 : index
      %172 = vector.load %arg3[%171, %c128, %c0_54] : memref<3x192x128xf32, #tpu.memory_space<vmem>>, vector<1x64x32xf32>
      %173 = vector.shape_cast %172 : vector<1x64x32xf32> to vector<64x32xf32>
      %cst_55 = arith.constant dense<0.000000e+00> : vector<50x32xf32>
      %174 = tpu.matmul %170, %173, %cst_55 {dimension_numbers = #tpu.dot_dimension_numbers<[1], [0], [0], [1], [0, 0, 1, 1], [], []>} : vector<50x64xf32>, vector<64x32xf32>, vector<50x32xf32> -> vector<50x32xf32>
      %175 = arith.index_cast %arg6 : i32 to index
      %c7 = arith.constant 7 : index
      %c0_56 = arith.constant 0 : index
      %176 = vector.load %arg4[%175, %c7, %c0_56] : memref<3x8x64xf32, #tpu.memory_space<vmem>>, vector<1x1x32xf32>
      %177 = vector.shape_cast %176 : vector<1x1x32xf32> to vector<1x32xf32>
      %178 = vector.broadcast %177 : vector<1x32xf32> to vector<50x32xf32>
      %179 = arith.addf %174, %178 : vector<50x32xf32>
      %180 = arith.addf %131, %179 : vector<50x32xf32>
      scf.yield %180 : vector<50x32xf32>
    }
    %c3_i32_6 = arith.constant 3 : i32
    %c0_7 = arith.constant 0 : index
    %c0_8 = arith.constant 0 : index
    %c0_9 = arith.constant 0 : index
    %6 = vector.load %arg5[%c0_7, %c0_8, %c0_9] : memref<1x50x32xf32, #tpu.memory_space<vmem>>, vector<1x50x32xf32>
    %7 = vector.shape_cast %6 : vector<1x50x32xf32> to vector<50x32xf32>
    %8 = vector.shape_cast %5 : vector<50x32xf32> to vector<1x50x32xf32>
    tpu.vector_store %arg5[%c0_7, %c0_8, %c0_9], %8 {strides = array<i32>} : memref<1x50x32xf32, #tpu.memory_space<vmem>>, vector<1x50x32xf32>,
    return
  }
  func.func @transform_0(%arg0: i32) -> (i32, i32, i32) {
    %c0_i32 = arith.constant 0 : i32
    %c0_i32_0 = arith.constant 0 : i32
    %c0_i32_1 = arith.constant 0 : i32
    return %arg0, %c0_i32, %c0_i32_0 : i32, i32, i32
  }
  func.func @transform_1(%arg0: i32) -> (i32, i32, i32, i32) {
    %c0_i32 = arith.constant 0 : i32
    %c0_i32_0 = arith.constant 0 : i32
    %c0_i32_1 = arith.constant 0 : i32
    %c0_i32_2 = arith.constant 0 : i32
    return %arg0, %c0_i32, %c0_i32_0, %c0_i32_1 : i32, i32, i32, i32
  }
  func.func @transform_2(%arg0: i32) -> (i32, i32, i32) {
    %c0_i32 = arith.constant 0 : i32
    %c0_i32_0 = arith.constant 0 : i32
    %c0_i32_1 = arith.constant 0 : i32
    %c0_i32_2 = arith.constant 0 : i32
    return %c0_i32, %c0_i32_0, %c0_i32_1 : i32, i32, i32
  }
  func.func @transform_3(%arg0: i32) -> (i32, i32, i32) {
    %c0_i32 = arith.constant 0 : i32
    %c0_i32_0 = arith.constant 0 : i32
    %c0_i32_1 = arith.constant 0 : i32
    %c0_i32_2 = arith.constant 0 : i32
    return %c0_i32, %c0_i32_0, %c0_i32_1 : i32, i32, i32
  }
  func.func @transform_4(%arg0: i32) -> (i32, i32, i32) {
    %c0_i32 = arith.constant 0 : i32
    %c0_i32_0 = arith.constant 0 : i32
    %c0_i32_1 = arith.constant 0 : i32
    return %arg0, %c0_i32, %c0_i32_0 : i32, i32, i32
  }
}

</mosaic_0001>

<bundles_post_ra>
// kernel: tpu_custom_call.1
= control target key start
LH: loop header
LB: loop body
LE: loop exit
PB: predicated region body
PF: predicated region fallthrough
CT: control target
= control target key end

     0   :  { %9 = vsyncpa [#allocation3], 0  ;;  %s3695_s15 = smov 0   ;;  %s4786_s0 = inlined_call_operand.vmem [shape: f32[2,50,32], index: 0, kind: input, shape index: {}]   ;;  %s4787_s1 = inlined_call_operand.vmem [shape: f32[2,1,50,50], index: 1, kind: input, shape index: {}]   ;;  %s4788_s2 = inlined_call_operand.hbm [shape: f32[3,192,128], index: 2, kind: input, shape index: {}]   ;;  %s4789_s3 = inlined_call_operand.vmem [shape: f32[3,8,64], index: 3, kind: input, shape index: {}]   ;;  %s4790_s4 = inlined_call_operand.vmem [shape: f32[2,50,32], index: 4, kind: output, shape index: {}]  }
   0x1 LB: > { %s2680_s16 = sadd.s32 4294967295, %s3625_s15   ;;  %p2682_p0 = scmp.ge.s32.totalorder %s3625_s15, 1  ;;  %s3625_s15 = sphi %s3695_s15, %s15_s15  }
   0x2   : > { %p140_p1 = scmp.lt.s32.totalorder %s3625_s15, 3  ;;  %s3659_s17 = smov [#allocation2]  }
   0x3   : > { %s152_s18 = sshll.u32 %s3659_s17, 4  ;;  %p3332_p3 = scmp.eq.s32.totalorder %s2680_s16, 0  ;;  %s153_s18 = int_to_ptr.vmem [resolvable:$true] %s152_s18 }
   0x4   : > { %p3703_p2 = pnand %p2682_p0, %p140_p1  ;;  %s3568_s20 = scalar_lea.vmem %s153_s18, 9216 }
   0x5   : > { %p3569_p7 = scmp.ne.s32.totalorder %s153_s18, %s3568_s20  ;;  %p3576_p10 = scmp.lt.s32.totalorder %s153_s18, %s153_s18 }
   0x6   : > { %p3328_p4 = pneg %p3703_p2  ;;  %p3577_p11 = scmp.lt.s32.totalorder %s3568_s20, %s3568_s20 }
   0x8   : > { %p3329_p5 = pnand %p3332_p3, %p3328_p4  ;;  %p3578_p12 = por %p3577_p11, %p3576_p10 }
   0xa   : > { %p3559_p6 = pneg %p3329_p5 }
   0xc   : > { %p3571_p8 = pnand %p3569_p7, %p3559_p6 }
   0xe   : > { %p3572_p9 = pneg %p3571_p8 }
  0x10   : > { %p3579_p13 = pnand %p3578_p12, %p3572_p9 }
  0x12   : > { %3582 = shalt.err (!%p3579_p13)
}
  0x13   : > { %s3660_s21 = smov 128   ;;  %s3661_s22 = smov 8  }
  0x14   : > { %3331 = dma.hbm_to_vmem [thread:$0]  (!%p3329_p5), %s4788_s2, 9216, %s153_s18, [#allocation3], %s3660_s21, %s3660_s21, %s3661_s22  }
  0x15   : > { %187 = sbr.rel (%p3703_p2) target bundleno = 2169 (0x879), region = 36 }
  0x1a   : > { %3620 = dma.done.wait (%p3332_p3), [#allocation3], 9216  }
  0x1b   : > { %3622 = vsyncadd (%p3332_p3), [#allocation3], 4294958080  ;;  %p218_p0 = scmp.lt.s32.totalorder %s2680_s16, 1  ;;  %s3756_s9 = smov 0  }
  0x1d   : > { %s4818_s16 = smov (!%p218_p0, %s2680_s16), 1 }
  0x1e   : > { %s3323_s25 = smul.u32 56, %s4818_s16 }
  0x20   : > { %s222_s28 = scalar_lea.vmem %s4786_s0, %s3323_s25  ;;  %s227_s5 = scalar_lea.vmem %s4787_s1, %s3323_s25 }
  0x21   : > { %s3726_s8 = scalar_lea.vmem %s4790_s4, %s3323_s25  ;;  %v233_v0 = vld [vmem:[%s222_s28] sm:$0xff]   ;;  %v234_v1 = vld [vmem:[%s222_s28 + $0x8] sm:$0xff]   ;;  %v235_v2 = vld [vmem:[%s222_s28 + $0x10] sm:$0xff]  }
  0x22   : > { %v236_v3 = vld [vmem:[%s222_s28 + $0x18] sm:$0xff]   ;;  %v237_v4 = vld [vmem:[%s222_s28 + $0x20] sm:$0xff]   ;;  %v238_v5 = vld [vmem:[%s222_s28 + $0x28] sm:$0xff]  }
  0x23   : > { %v239_v6 = vld [vmem:[%s222_s28 + $0x30] sm:$0x3]   ;;  %v3728_v7 = vld [vmem:[%s227_s5] sm:$0xff]  ;;  %v3730_v8 = vld [vmem:[%s227_s5 + $0x8] sm:$0xff] }
  0x24   : > { %4799 = vst [vmem:[#allocation5_spill] sm:$0xff] %v3728_v7  ;;  %4800 = vst [vmem:[#allocation6_spill] sm:$0xff] %v3730_v8  ;;  %v3732_v9 = vld [vmem:[%s227_s5 + $0x10] sm:$0xff]  ;;  %v3734_v10 = vld [vmem:[%s227_s5 + $0x18] sm:$0xff] }
  0x25   : > { %4801 = vst [vmem:[#allocation7_spill] sm:$0xff] %v3732_v9  ;;  %4802 = vst [vmem:[#allocation8_spill] sm:$0xff] %v3734_v10  ;;  %v3736_v11 = vld [vmem:[%s227_s5 + $0x20] sm:$0xff]  ;;  %v3738_v12 = vld [vmem:[%s227_s5 + $0x28] sm:$0xff] }
  0x26   : > { %4803 = vst [vmem:[#allocation9_spill] sm:$0xff] %v3736_v11  ;;  %v3740_v13 = vld [vmem:[%s227_s5 + $0x30] sm:$0x3] }
  0x27 LB: >> { %vm264_vm0 = vcmask 261120   ;;  %vm283_vm1 = vcmask 254976   ;;  %s380_s10 = smul.u32 192, %s3657_s9  ;;  %v4791_v56 = vmov 0.0   ;;  %vm3663_vm2 = vmmov 0   ;;  %s2690_s12 = sshll.u32 %s3657_s9, 3  ;;  %v3645_v2 = vphi %v235_v2, %v4814_v2   ;;  %v3641_v3 = vphi %v236_v3, %v4813_v3   ;;  %v3637_v4 = vphi %v237_v4, %v4812_v4   ;;  %v3633_v5 = vphi %v238_v5, %v4811_v5   ;;  %v3629_v6 = vphi %v239_v6, %v4810_v6   ;;  %s3657_s9 = sphi %s3756_s9, %s252_s9   ;;  %v3653_v0 = vphi %v233_v0, %v4816_v0   ;;  %v3649_v1 = vphi %v234_v1, %v4815_v1  }
  0x28   : >> { %v265_v14 = vsel %vm264_vm0, %v3653_v0, 0.0  ;;  %v284_v15 = vsel %vm283_vm1, %v3629_v6, 0.0  ;;  %v268_v16 = vsel %vm264_vm0, %v3649_v1, 0.0  ;;  %v271_v17 = vsel %vm264_vm0, %v3645_v2, 0.0  ;;  %2947 = vmatprep.subr.mxu1 %v4791_v56  ;;  %2996 = vmatprep.subr.mxu0 %v4791_v56  ;;  %s3858_s16 = scalar_lea.vmem %s4789_s3, %s2690_s12  ;;  %s3664_s17 = smov 120  }
  0x29   : >> { %266 = vadd.xlane.f32.xlu0 %v265_v14  ;;  %285 = vadd.xlane.f32.xlu1 %v284_v15  ;;  %v280_v18 = vsel %vm264_vm0, %v3633_v5, 0.0  ;;  %v274_v19 = vsel %vm264_vm0, %v3641_v3, 0.0  ;;  %v277_v20 = vsel %vm264_vm0, %v3637_v4, 0.0  ;;  %s3840_s11 = scalar_lea.vmem [#allocation2], %s380_s10  ;;  %s3665_s18 = smov 96   ;;  %vm752_vm3 = vcmask 64512  }
  0x2a   : >> { %v385_v57 = vld [vmem:[%s3840_s11 + $0x18] sm:$0xff]  ;;  %v384_v58 = vld [vmem:[%s3840_s11 + $0x10] sm:$0xff]  ;;  %2955 = vmatprep.mubr.msk.f32.mxu1 %vm3663_vm2, %v4791_v56  ;;  %v383_v59 = vld [vmem:[%s3840_s11 + $0x8] sm:$0xff]  ;;  %3004 = vmatprep.mubr.msk.f32.mxu0 %vm3663_vm2, %v4791_v56  ;;  %s3666_s19 = smov 112   ;;  %s3667_s20 = smov 104   ;;  %vm867_vm4 = vcmask 408576  }
  0x2b   : >> { %v4807_v8 = vld [vmem:[#allocation6_spill] sm:$0xff]  ;;  %v4808_v7 = vld [vmem:[#allocation5_spill] sm:$0xff]  ;;  %2948 = vmatpush3.msra.mxu1 %v385_v57  ;;  %vm886_vm5 = vcmask 402432   ;;  %s3668_s21 = smov 64   ;;  %vm932_vm6 = vcmask 1041408   ;;  %s3669_s22 = smov 32  }
  0x2c   : >> { %v4805_v10 = vld [vmem:[#allocation8_spill] sm:$0xff]  ;;  %v4806_v9 = vld [vmem:[#allocation7_spill] sm:$0xff]  ;;  %2949 = vmatprep.subr.mxu1 %v4791_v56  ;;  %v382_v60 = vld [vmem:[%s3840_s11] sm:$0xff]  ;;  %vm2433_vm7 = vcmask 523264   ;;  %s252_s9 = sadd.s32 1, %s3657_s9  }
  0x2d   : >> { %v4804_v11 = vld [vmem:[#allocation9_spill] sm:$0xff]  ;;  %269 = vadd.xlane.f32.xlu0 %v268_v16  ;;  %272 = vadd.xlane.f32.xlu1 %v271_v17  ;;  %p249_p1 = scmp.ge.s32.totalorder %s252_s9, 3  }
  0x2e   : >> { %2950 = vmatpush3.msra.mxu1 %v384_v58 }
  0x2f   : >> { %2951 = vmatprep.subr.mxu1 %v4791_v56 }
  0x30   : >> { %2952 = vmatpush3.msra.mxu1 %v383_v59 }
  0x31   : >> { %281 = vadd.xlane.f32.xlu0 %v280_v18  ;;  %275 = vadd.xlane.f32.xlu1 %v274_v19 }
  0x32   : >> { %2953 = vmatprep.subr.mxu1 %v4791_v56 }
  0x33   : >> { %2954 = vmatpush3.msra.mxu1 %v382_v60 }
  0x35   : >> { %278 = vadd.xlane.f32.xlu0 %v277_v20 }
  0xb2   : >> { %v267_v21 = vpop.xlane.xlu0 %266  ;;  %v286_v22 = vpop.xlane.xlu1 %285 }
  0xb3   : >> { %v288_v23 = vmul.f32 0.03125, %v267_v21  ;;  %v294_v24 = vmul.f32 0.03125, %v286_v22 }
  0xb5   : >> { %v3797_v25 = vsub.f32 %v3653_v0, %v288_v23  ;;  %v3800_v26 = vsub.f32 %v3629_v6, %v294_v24 }
  0xb6   : >> { %v270_v27 = vpop.xlane.xlu0 %269  ;;  %v273_v28 = vpop.xlane.xlu1 %272 }
  0xb7   : >> { %v289_v29 = vmul.f32 0.03125, %v270_v27  ;;  %v302_v30 = vmul.f32 %v3797_v25, %v3797_v25  ;;  %v290_v31 = vmul.f32 0.03125, %v273_v28  ;;  %v308_v32 = vmul.f32 %v3800_v26, %v3800_v26 }
  0xb9   : >> { %v3807_v33 = vsub.f32 %v3649_v1, %v289_v29  ;;  %v309_v34 = vsel %vm264_vm0, %v302_v30, 0.0  ;;  %v3811_v35 = vsub.f32 %v3645_v2, %v290_v31  ;;  %v327_v37 = vsel %vm283_vm1, %v308_v32, 0.0 }
  0xba   : >> { %v282_v36 = vpop.xlane.xlu0 %281  ;;  %310 = vadd.xlane.f32.xlu1 %v309_v34  ;;  %v276_v38 = vpop.xlane.xlu1 %275 }
  0xbb   : >> { %v293_v39 = vmul.f32 0.03125, %v282_v36  ;;  %v303_v40 = vmul.f32 %v3807_v33, %v3807_v33  ;;  %v291_v41 = vmul.f32 0.03125, %v276_v38  ;;  %v304_v42 = vmul.f32 %v3811_v35, %v3811_v35 }
  0xbd   : >> { %v3819_v43 = vsub.f32 %v3633_v5, %v293_v39  ;;  %v312_v44 = vsel %vm264_vm0, %v303_v40, 0.0  ;;  %v3823_v45 = vsub.f32 %v3641_v3, %v291_v41  ;;  %v315_v49 = vsel %vm264_vm0, %v304_v42, 0.0  ;;  %v2692_v39 = vld [vmem:[%s3858_s16 + $0x1] ss:$0 sm:$0xff] }
  0xbe   : >> { %313 = vadd.xlane.f32.xlu0 %v312_v44  ;;  %v279_v46 = vpop.xlane.xlu0 %278  ;;  %328 = vadd.xlane.f32.xlu1 %v327_v37  ;;  %v2691_v37 = vld [vmem:[%s3858_s16] ss:$0 sm:$0xff] }
  0xbf   : >> { %v292_v47 = vmul.f32 0.03125, %v279_v46  ;;  %v307_v48 = vmul.f32 %v3819_v43, %v3819_v43  ;;  %v305_v50 = vmul.f32 %v3823_v45, %v3823_v45 }
  0xc1   : >> { %v3831_v51 = vsub.f32 %v3637_v4, %v292_v47  ;;  %v324_v52 = vsel %vm264_vm0, %v307_v48, 0.0  ;;  %v318_v54 = vsel %vm264_vm0, %v305_v50, 0.0 }
  0xc2   : >> { %325 = vadd.xlane.f32.xlu1 %v324_v52  ;;  %316 = vadd.xlane.f32.xlu0 %v315_v49 }
  0xc3   : >> { %v306_v53 = vmul.f32 %v3831_v51, %v3831_v51 }
  0xc5   : >> { %v321_v55 = vsel %vm264_vm0, %v306_v53, 0.0 }
  0xc6   : >> { %322 = vadd.xlane.f32.xlu1 %v321_v55  ;;  %319 = vadd.xlane.f32.xlu0 %v318_v54 }
 0x143   : >> { %v311_v61 = vpop.xlane.xlu1 %310 }
 0x144   : >> { %v330_v62 = vmul.f32 0.03125, %v311_v61 }
 0x146   : >> { %v337_v63 = vadd.f32 1e-05, %v330_v62 }
 0x147   : >> { %v314_v14 = vpop.xlane.xlu0 %313  ;;  %v329_v15 = vpop.xlane.xlu1 %328 }
 0x148   : >> { %3417 = vrsqrt.f32 %v337_v63  ;;  %v331_v16 = vmul.f32 0.03125, %v314_v14  ;;  %v336_v17 = vmul.f32 0.03125, %v329_v15  ;;  %v514_v15 = vld [vmem:[%s3840_s11 + $0x30] sm:$0xff] }
 0x14a   : >> { %v338_v18 = vadd.f32 1e-05, %v331_v16  ;;  %v343_v19 = vadd.f32 1e-05, %v336_v17  ;;  %v515_v16 = vld [vmem:[%s3840_s11 + $0x38] sm:$0xff] }
 0x14b   : >> { %v317_v20 = vpop.xlane.xlu0 %316  ;;  %v326_v21 = vpop.xlane.xlu1 %325  ;;  %v616_v17 = vld [vmem:[%s3840_s11 + $0x58] sm:$0xff] }
 0x14c   : >> { %3419 = vrsqrt.f32 %v338_v18  ;;  %v332_v22 = vmul.f32 0.03125, %v317_v20  ;;  %v335_v23 = vmul.f32 0.03125, %v326_v21  ;;  %v615_v18 = vld [vmem:[%s3840_s11 + $0x50] sm:$0xff]  ;;  %2997 = vmatpush3.msra.mxu0 %v616_v17  ;;  %v613_v20 = vld [vmem:[%s3840_s11 + $0x40] sm:$0xff] }
 0x14d   : >> { %3421 = vrsqrt.f32 %v343_v19  ;;  %2998 = vmatprep.subr.mxu0 %v4791_v56  ;;  %v614_v19 = vld [vmem:[%s3840_s11 + $0x48] sm:$0xff]  ;;  %v2693_v21 = vld [vmem:[%s3858_s16 + $0x2] ss:$0 sm:$0xff] }
 0x14e   : >> { %v339_v24 = vadd.f32 1e-05, %v332_v22  ;;  %v342_v27 = vadd.f32 1e-05, %v335_v23  ;;  %2999 = vmatpush3.msra.mxu0 %v615_v18 }
 0x14f   : >> { %v320_v28 = vpop.xlane.xlu0 %319  ;;  %v323_v29 = vpop.xlane.xlu1 %322  ;;  %3000 = vmatprep.subr.mxu0 %v4791_v56 }
 0x150   : >> { %3423 = vrsqrt.f32 %v339_v24  ;;  %v333_v30 = vmul.f32 0.03125, %v320_v28  ;;  %v334_v31 = vmul.f32 0.03125, %v323_v29  ;;  %3001 = vmatpush3.msra.mxu0 %v614_v19 }
 0x151   : >> { %3425 = vrsqrt.f32 %v342_v27  ;;  %3002 = vmatprep.subr.mxu0 %v4791_v56 }
 0x152   : >> { %v340_v32 = vadd.f32 1e-05, %v333_v30  ;;  %v341_v34 = vadd.f32 1e-05, %v334_v31  ;;  %3003 = vmatpush3.msra.mxu0 %v613_v20 }
 0x153   : >> { %3048 = vmatprep.subr.mxu0 %v4791_v56 }
 0x154   : >> { %3427 = vrsqrt.f32 %v340_v32 }
 0x155   : >> { %v3418_v36 = vpop.eup %3417  ;;  %3429 = vrsqrt.f32 %v341_v34 }
 0x156   : >> { %v351_v38 = vmul.f32 %v3418_v36, %v3797_v25 }
 0x158   : >> { %v362_v40 = vmul.f32 %v2691_v37, %v351_v38 }
 0x159   : >> { %v3420_v41 = vpop.eup %3419 }
 0x15a   : >> { %v3422_v42 = vpop.eup %3421  ;;  %v373_v44 = vadd.f32 %v2692_v39, %v362_v40  ;;  %v352_v46 = vmul.f32 %v3420_v41, %v3807_v33 }
 0x15b   : >> { %v357_v47 = vmul.f32 %v3422_v42, %v3800_v26 }
 0x15c   : >> { %2956 = vmatmul.mubr.msk.f32.vlgmr.msra.gmra.mxu1 %vm264_vm0, %v373_v44  ;;  %v363_v48 = vmul.f32 %v2691_v37, %v352_v46 }
 0x15d   : >> { %v3424_v49 = vpop.eup %3423  ;;  %2958 = vmatprep.mubr.msk.f32.mxu1 %vm3663_vm2, %v4791_v56  ;;  %v368_v50 = vmul.f32 %v2691_v37, %v357_v47 }
 0x15e   : >> { %v3426_v52 = vpop.eup %3425  ;;  %v374_v53 = vadd.f32 %v2692_v39, %v363_v48  ;;  %v353_v25 = vmul.f32 %v3424_v49, %v3811_v35 }
 0x15f   : >> { %v379_v54 = vadd.f32 %v2692_v39, %v368_v50  ;;  %v356_v55 = vmul.f32 %v3426_v52, %v3819_v43 }
 0x160   : >> { %2959 = vmatmul.mubr.msk.f32.gmra.mxu1 %vm264_vm0, %v374_v53  ;;  %v364_v33 = vmul.f32 %v2691_v37, %v353_v25 }
 0x161   : >> { %v3428_v57 = vpop.eup %3427  ;;  %2976 = vmatprep.subr.msk.mxu1 %vm264_vm0, %v379_v54  ;;  %2961 = vmatprep.mubr.msk.f32.mxu1 %vm3663_vm2, %v4791_v56  ;;  %v367_v26 = vmul.f32 %v2691_v37, %v356_v55 }
 0x162   : >> { %v3430_v58 = vpop.eup %3429  ;;  %2977 = vmatpush3.xpose.msk.msra.mxu1 %vm264_vm0, %v379_v54  ;;  %v375_v59 = vadd.f32 %v2692_v39, %v364_v33  ;;  %v354_v60 = vmul.f32 %v3428_v57, %v3823_v45  ;;  %v512_v45 = vld [vmem:[%s3840_s11 + $0x20] sm:$0xff] }
 0x163   : >> { %v378_v35 = vadd.f32 %v2692_v39, %v367_v26  ;;  %v355_v61 = vmul.f32 %v3430_v58, %v3831_v51  ;;  %v513_v51 = vld [vmem:[%s3840_s11 + $0x28] sm:$0xff] }
 0x164   : >> { %2962 = vmatmul.mubr.msk.f32.gmra.mxu1 %vm264_vm0, %v375_v59  ;;  %v365_v43 = vmul.f32 %v2691_v37, %v354_v60 }
 0x165   : >> { %2978 = vmatprep.subr.msk.mxu1 %vm264_vm0, %v378_v35  ;;  %2964 = vmatprep.mubr.msk.f32.mxu1 %vm3663_vm2, %v4791_v56  ;;  %v366_v62 = vmul.f32 %v2691_v37, %v355_v61 }
 0x166   : >> { %2979 = vmatpush3.xpose.msk.msra.mxu1 %vm264_vm0, %v378_v35  ;;  %v376_v63 = vadd.f32 %v2692_v39, %v365_v43 }
 0x167   : >> { %v377_v14 = vadd.f32 %v2692_v39, %v366_v62 }
 0x168   : >> { %2965 = vmatmul.mubr.msk.f32.gmra.mxu1 %vm264_vm0, %v376_v63 }
 0x169   : >> { %2980 = vmatprep.subr.msk.mxu1 %vm264_vm0, %v377_v14  ;;  %2967 = vmatprep.mubr.msk.f32.mxu1 %vm3663_vm2, %v4791_v56 }
 0x16a   : >> { %2981 = vmatpush3.xpose.msk.msra.mxu1 %vm264_vm0, %v377_v14 }
 0x16b   : >> { %2982 = vmatprep.subr.msk.mxu1 %vm264_vm0, %v376_v63 }
 0x16c   : >> { %2968 = vmatmul.mubr.msk.f32.gmra.mxu1 %vm264_vm0, %v377_v14 }
 0x16d   : >> { %2970 = vmatprep.mubr.msk.f32.mxu1 %vm3663_vm2, %v4791_v56 }
 0x16e   : >> { %2983 = vmatpush3.xpose.msk.msra.mxu1 %vm264_vm0, %v376_v63 }
 0x16f   : >> { %2984 = vmatprep.subr.msk.mxu1 %vm264_vm0, %v375_v59 }
 0x170   : >> { %2971 = vmatmul.mubr.msk.f32.gmra.mxu1 %vm264_vm0, %v378_v35 }
 0x171   : >> { %2973 = vmatprep.mubr.msk.f32.mxu1 %vm3663_vm2, %v4791_v56 }
 0x172   : >> { %2985 = vmatpush3.xpose.msk.msra.mxu1 %vm264_vm0, %v375_v59 }
 0x173   : >> { %2986 = vmatprep.subr.msk.mxu1 %vm264_vm0, %v374_v53 }
 0x174   : >> { %2974 = vmatmul.mubr.msk.f32.gmra.mxu1 %vm264_vm0, %v379_v54 }
 0x175   : >> { %2990 = vmatprep.mubr.msk.f32.mxu1 %vm264_vm0, %v512_v45 }
 0x176   : >> { %2987 = vmatpush3.xpose.msk.msra.mxu1 %vm264_vm0, %v374_v53 }
 0x177   : >> { %2988 = vmatprep.subr.msk.mxu1 %vm264_vm0, %v373_v44 }
 0x17a   : >> { %2989 = vmatpush3.xpose.msk.msra.mxu1 %vm264_vm0, %v373_v44 }
 0x17b   : >> { %3025 = vmatprep.subr.mxu1 %v4791_v56 }
 0x17d   : >> { %2991 = vmatmul.mubr.msk.f32.vlgmr.msra.gmra.mxu1 %vm264_vm0, %v513_v51 }
 0x17e   : >> { %2993 = vmatprep.mubr.msk.f32.mxu1 %vm264_vm0, %v514_v15 }
 0x181   : >> { %2994 = vmatmul.mubr.msk.f32.gmra.mxu1 %vm264_vm0, %v515_v16 }
 0x182   : >> { %3027 = vmatprep.mubr.msk.f32.mxu1 %vm3663_vm2, %v4791_v56 }
 0x21c   : >> { %v478_v22 = vpop.f32.mrf.mxu1 }
 0x21d   : >> { %v479_v23 = vadd.f32 %v2693_v21, %v478_v22 }
 0x21e   : >> { %v2957_v24 = vpop.f32.mrf.mxu1 }
 0x21f   : >> { %1078 = vrot.lane.b32.xlu1 %v479_v23, %s3664_s17  ;;  %624 = vrot.lane.b32.xlu0 %v479_v23, %s3665_s18 }
 0x220   : >> { %v483_v27 = vpop.f32.mrf.mxu1 }
 0x221   : >> { %v484_v28 = vadd.f32 %v2693_v21, %v483_v27 }
 0x222   : >> { %v2960_v29 = vpop.f32.mrf.mxu1 }
 0x223   : >> { %1080 = vrot.lane.b32.xlu0 %v484_v28, %s3664_s17  ;;  %626 = vrot.lane.b32.xlu1 %v484_v28, %s3665_s18 }
 0x224   : >> { %v488_v30 = vpop.f32.mrf.mxu1 }
 0x225   : >> { %v489_v31 = vadd.f32 %v2693_v21, %v488_v30 }
 0x226   : >> { %v2963_v32 = vpop.f32.mrf.mxu1 }
 0x227   : >> { %1082 = vrot.lane.b32.xlu0 %v489_v31, %s3664_s17  ;;  %628 = vrot.lane.b32.xlu1 %v489_v31, %s3665_s18 }
 0x228   : >> { %v493_v34 = vpop.f32.mrf.mxu1 }
 0x229   : >> { %v494_v36 = vadd.f32 %v2693_v21, %v493_v34 }
 0x22a   : >> { %v2966_v37 = vpop.f32.mrf.mxu1 }
 0x22b   : >> { %1084 = vrot.lane.b32.xlu0 %v494_v36, %s3664_s17  ;;  %630 = vrot.lane.b32.xlu1 %v494_v36, %s3665_s18 }
 0x22c   : >> { %v498_v38 = vpop.f32.mrf.mxu1 }
 0x22d   : >> { %v499_v39 = vadd.f32 %v2693_v21, %v498_v38 }
 0x22e   : >> { %v2969_v40 = vpop.f32.mrf.mxu1 }
 0x22f   : >> { %1086 = vrot.lane.b32.xlu0 %v499_v39, %s3664_s17  ;;  %632 = vrot.lane.b32.xlu1 %v499_v39, %s3665_s18 }
 0x230   : >> { %v503_v41 = vpop.f32.mrf.mxu1 }
 0x231   : >> { %v504_v42 = vadd.f32 %v2693_v21, %v503_v41 }
 0x232   : >> { %v2972_v44 = vpop.f32.mrf.mxu1 }
 0x233   : >> { %1088 = vrot.lane.b32.xlu0 %v504_v42, %s3664_s17  ;;  %634 = vrot.lane.b32.xlu1 %v504_v42, %s3665_s18 }
 0x234   : >> { %v508_v46 = vpop.f32.mrf.mxu1 }
 0x235   : >> { %v509_v47 = vadd.f32 %v2693_v21, %v508_v46 }
 0x236   : >> { %v2975_v48 = vpop.f32.mrf.mxu1 }
 0x237   : >> { %1439 = vrot.lane.b32.xlu0 %v479_v23, %s3666_s19  ;;  %636 = vrot.lane.b32.xlu1 %v509_v47, %s3665_s18 }
 0x23b   : >> { %1443 = vrot.lane.b32.xlu0 %v489_v31, %s3666_s19  ;;  %1090 = vrot.lane.b32.xlu1 %v509_v47, %s3664_s17 }
 0x23d   : >> { %v2992_v49 = vpop.f32.mrf.mxu1 }
 0x23f   : >> { %v594_v50 = vpop.f32.mrf.mxu1  ;;  %1447 = vrot.lane.b32.xlu0 %v499_v39, %s3666_s19  ;;  %1441 = vrot.lane.b32.xlu1 %v484_v28, %s3666_s19 }
 0x240   : >> { %3026 = vmatpush3.msra.mxu1 %v594_v50 }
 0x241   : >> { %3028 = vmatmul.mubr.msk.f32.vlgmr.msra.gmra.mxu1 %vm752_vm3, %v479_v23  ;;  %3083 = vmatprep.subr.mxu1 %v4791_v56  ;;  %v2995_v52 = vpop.f32.mrf.mxu1 }
 0x242   : >> { %3030 = vmatprep.mubr.msk.f32.mxu1 %vm3663_vm2, %v4791_v56  ;;  %3084 = vmatpush3.msra.mxu1 %v2992_v49 }
 0x243   : >> { %1796 = vrot.lane.b32.xlu0 %v484_v28, %s3667_s20  ;;  %1445 = vrot.lane.b32.xlu1 %v494_v36, %s3666_s19  ;;  %v604_v53 = vpop.f32.mrf.mxu1 }
 0x244   : >> { %3141 = vmatprep.subr.mxu1 %v4791_v56 }
 0x245   : >> { %3031 = vmatmul.mubr.msk.f32.gmra.mxu1 %vm752_vm3, %v484_v28 }
 0x246   : >> { %3033 = vmatprep.mubr.msk.f32.mxu1 %vm3663_vm2, %v4791_v56 }
 0x247   : >> { %1800 = vrot.lane.b32.xlu0 %v494_v36, %s3667_s20  ;;  %1449 = vrot.lane.b32.xlu1 %v504_v42, %s3666_s19 }
 0x249   : >> { %3034 = vmatmul.mubr.msk.f32.gmra.mxu1 %vm752_vm3, %v489_v31 }
 0x24a   : >> { %3036 = vmatprep.mubr.msk.f32.mxu1 %vm3663_vm2, %v4791_v56 }
 0x24b   : >> { %1804 = vrot.lane.b32.xlu0 %v504_v42, %s3667_s20  ;;  %1794 = vrot.lane.b32.xlu1 %v479_v23, %s3667_s20 }
 0x24d   : >> { %3037 = vmatmul.mubr.msk.f32.gmra.mxu1 %vm752_vm3, %v494_v36 }
 0x24e   : >> { %3039 = vmatprep.mubr.msk.f32.mxu1 %vm3663_vm2, %v4791_v56 }
 0x24f   : >> { %1451 = vrot.lane.b32.xlu0 %v509_v47, %s3666_s19  ;;  %1798 = vrot.lane.b32.xlu1 %v489_v31, %s3667_s20 }
 0x251   : >> { %3040 = vmatmul.mubr.msk.f32.gmra.mxu1 %vm752_vm3, %v499_v39 }
 0x252   : >> { %3042 = vmatprep.mubr.msk.f32.mxu1 %vm3663_vm2, %v4791_v56 }
 0x253   : >> { %1802 = vrot.lane.b32.xlu1 %v499_v39, %s3667_s20 }
 0x255   : >> { %3043 = vmatmul.mubr.msk.f32.gmra.mxu1 %vm752_vm3, %v504_v42 }
 0x256   : >> { %3045 = vmatprep.mubr.msk.f32.mxu1 %vm3663_vm2, %v4791_v56 }
 0x257   : >> { %1806 = vrot.lane.b32.xlu1 %v509_v47, %s3667_s20 }
 0x259   : >> { %3046 = vmatmul.mubr.msk.f32.gmra.mxu1 %vm752_vm3, %v509_v47 }
 0x25a   : >> { %3085 = vmatprep.mubr.msk.f32.mxu1 %vm3663_vm2, %v4791_v56 }
 0x291   : >> { %v625_v25 = vpop.permute.xlu0 %624  ;;  %v1079_v54 = vpop.permute.xlu1 %1078 }
 0x292   : >> { %3005 = vmatmul.mubr.msk.f32.vlgmr.msra.gmra.mxu0 %vm264_vm0, %v625_v25  ;;  %3086 = vmatmul.mubr.msk.f32.vlgmr.msra.gmra.mxu1 %vm752_vm3, %v1079_v54 }
 0x293   : >> { %3007 = vmatprep.mubr.msk.f32.mxu0 %vm3663_vm2, %v4791_v56  ;;  %3088 = vmatprep.mubr.msk.f32.mxu1 %vm3663_vm2, %v4791_v56 }
 0x294   : >> { %3142 = vmatpush3.msra.mxu1 %v604_v53 }
 0x295   : >> { %v1081_v55 = vpop.permute.xlu0 %1080  ;;  %v627_v33 = vpop.permute.xlu1 %626  ;;  %3199 = vmatprep.subr.mxu1 %v4791_v56 }
 0x296   : >> { %3008 = vmatmul.mubr.msk.f32.gmra.mxu0 %vm264_vm0, %v627_v33  ;;  %3089 = vmatmul.mubr.msk.f32.gmra.mxu1 %vm752_vm3, %v1081_v55 }
 0x297   : >> { %3010 = vmatprep.mubr.msk.f32.mxu0 %vm3663_vm2, %v4791_v56  ;;  %3091 = vmatprep.mubr.msk.f32.mxu1 %vm3663_vm2, %v4791_v56 }
 0x299   : >> { %v1083_v57 = vpop.permute.xlu0 %1082  ;;  %v629_v26 = vpop.permute.xlu1 %628 }
 0x29a   : >> { %3011 = vmatmul.mubr.msk.f32.gmra.mxu0 %vm264_vm0, %v629_v26  ;;  %3092 = vmatmul.mubr.msk.f32.gmra.mxu1 %vm752_vm3, %v1083_v57 }
 0x29b   : >> { %3013 = vmatprep.mubr.msk.f32.mxu0 %vm3663_vm2, %v4791_v56  ;;  %3094 = vmatprep.mubr.msk.f32.mxu1 %vm3663_vm2, %v4791_v56 }
 0x29d   : >> { %v1085_v58 = vpop.permute.xlu0 %1084  ;;  %v631_v59 = vpop.permute.xlu1 %630 }
 0x29e   : >> { %3014 = vmatmul.mubr.msk.f32.gmra.mxu0 %vm264_vm0, %v631_v59  ;;  %3095 = vmatmul.mubr.msk.f32.gmra.mxu1 %vm752_vm3, %v1085_v58 }
 0x29f   : >> { %3016 = vmatprep.mubr.msk.f32.mxu0 %vm3663_vm2, %v4791_v56  ;;  %3097 = vmatprep.mubr.msk.f32.mxu1 %vm3663_vm2, %v4791_v56 }
 0x2a1   : >> { %v1087_v60 = vpop.permute.xlu0 %1086  ;;  %v633_v35 = vpop.permute.xlu1 %632 }
 0x2a2   : >> { %3017 = vmatmul.mubr.msk.f32.gmra.mxu0 %vm264_vm0, %v633_v35  ;;  %3098 = vmatmul.mubr.msk.f32.gmra.mxu1 %vm752_vm3, %v1087_v60 }
 0x2a3   : >> { %3019 = vmatprep.mubr.msk.f32.mxu0 %vm3663_vm2, %v4791_v56  ;;  %3100 = vmatprep.mubr.msk.f32.mxu1 %vm3663_vm2, %v4791_v56 }
 0x2a5   : >> { %v1089_v61 = vpop.permute.xlu0 %1088  ;;  %v635_v43 = vpop.permute.xlu1 %634 }
 0x2a6   : >> { %3020 = vmatmul.mubr.msk.f32.gmra.mxu0 %vm264_vm0, %v635_v43  ;;  %3101 = vmatmul.mubr.msk.f32.gmra.mxu1 %vm752_vm3, %v1089_v61 }
 0x2a7   : >> { %3022 = vmatprep.mubr.msk.f32.mxu0 %vm3663_vm2, %v4791_v56  ;;  %3103 = vmatprep.mubr.msk.f32.mxu1 %vm3663_vm2, %v4791_v56 }
 0x2a9   : >> { %v1440_v62 = vpop.permute.xlu0 %1439  ;;  %v637_v63 = vpop.permute.xlu1 %636 }
 0x2aa   : >> { %3023 = vmatmul.mubr.msk.f32.gmra.mxu0 %vm264_vm0, %v637_v63 }
 0x2ab   : >> { %3062 = vmatprep.mubr.msk.f32.mxu0 %vm3663_vm2, %v4791_v56 }
 0x2ad   : >> { %v1444_v14 = vpop.permute.xlu0 %1443  ;;  %v1091_v45 = vpop.permute.xlu1 %1090 }
 0x2ae   : >> { %3104 = vmatmul.mubr.msk.f32.gmra.mxu1 %vm752_vm3, %v1091_v45 }
 0x2af   : >> { %3143 = vmatprep.mubr.msk.f32.mxu1 %vm3663_vm2, %v4791_v56 }
 0x2b1   : >> { %v1448_v51 = vpop.permute.xlu0 %1447  ;;  %v1442_v15 = vpop.permute.xlu1 %1441 }
 0x2b2   : >> { %3144 = vmatmul.mubr.msk.f32.vlgmr.msra.gmra.mxu1 %vm752_vm3, %v1440_v62 }
 0x2b3   : >> { %3146 = vmatprep.mubr.msk.f32.mxu1 %vm3663_vm2, %v4791_v56  ;;  %3200 = vmatpush3.msra.mxu1 %v2995_v52 }
 0x2b4   : >> { %3257 = vmatprep.subr.mxu1 %v4791_v56 }
 0x2b5   : >> { %v1797_v16 = vpop.permute.xlu0 %1796  ;;  %v1446_v17 = vpop.permute.xlu1 %1445 }
 0x2b6   : >> { %3147 = vmatmul.mubr.msk.f32.gmra.mxu1 %vm752_vm3, %v1442_v15 }
 0x2b7   : >> { %3149 = vmatprep.mubr.msk.f32.mxu1 %vm3663_vm2, %v4791_v56 }
 0x2b9   : >> { %v1801_v18 = vpop.permute.xlu0 %1800  ;;  %v1450_v20 = vpop.permute.xlu1 %1449 }
 0x2ba   : >> { %3150 = vmatmul.mubr.msk.f32.gmra.mxu1 %vm752_vm3, %v1444_v14 }
 0x2bb   : >> { %3152 = vmatprep.mubr.msk.f32.mxu1 %vm3663_vm2, %v4791_v56 }
 0x2bd   : >> { %v1805_v19 = vpop.permute.xlu0 %1804  ;;  %v1795_v22 = vpop.permute.xlu1 %1794 }
 0x2be   : >> { %3153 = vmatmul.mubr.msk.f32.gmra.mxu1 %vm752_vm3, %v1446_v17 }
 0x2bf   : >> { %3155 = vmatprep.mubr.msk.f32.mxu1 %vm3663_vm2, %v4791_v56 }
 0x2c1   : >> { %v1452_v21 = vpop.permute.xlu0 %1451  ;;  %v1799_v23 = vpop.permute.xlu1 %1798 }
 0x2c2   : >> { %3156 = vmatmul.mubr.msk.f32.gmra.mxu1 %vm752_vm3, %v1448_v51 }
 0x2c3   : >> { %3158 = vmatprep.mubr.msk.f32.mxu1 %vm3663_vm2, %v4791_v56 }
 0x2c5   : >> { %v1803_v24 = vpop.permute.xlu1 %1802 }
 0x2c6   : >> { %3159 = vmatmul.mubr.msk.f32.gmra.mxu1 %vm752_vm3, %v1450_v20 }
 0x2c7   : >> { %3161 = vmatprep.mubr.msk.f32.mxu1 %vm3663_vm2, %v4791_v56 }
 0x2c9   : >> { %v1807_v27 = vpop.permute.xlu1 %1806 }
 0x2ca   : >> { %3162 = vmatmul.mubr.msk.f32.gmra.mxu1 %vm752_vm3, %v1452_v21 }
 0x2cb   : >> { %3201 = vmatprep.mubr.msk.f32.mxu1 %vm3663_vm2, %v4791_v56 }
 0x2ce   : >> { %3202 = vmatmul.mubr.msk.f32.vlgmr.msra.gmra.mxu1 %vm752_vm3, %v1795_v22 }
 0x2cf   : >> { %3204 = vmatprep.mubr.msk.f32.mxu1 %vm3663_vm2, %v4791_v56 }
 0x2d2   : >> { %3205 = vmatmul.mubr.msk.f32.gmra.mxu1 %vm752_vm3, %v1797_v16 }
 0x2d3   : >> { %3207 = vmatprep.mubr.msk.f32.mxu1 %vm3663_vm2, %v4791_v56 }
 0x2d6   : >> { %3208 = vmatmul.mubr.msk.f32.gmra.mxu1 %vm752_vm3, %v1799_v23 }
 0x2d7   : >> { %3210 = vmatprep.mubr.msk.f32.mxu1 %vm3663_vm2, %v4791_v56 }
 0x2da   : >> { %3211 = vmatmul.mubr.msk.f32.gmra.mxu1 %vm752_vm3, %v1801_v18 }
 0x2db   : >> { %3213 = vmatprep.mubr.msk.f32.mxu1 %vm3663_vm2, %v4791_v56 }
 0x2de   : >> { %3214 = vmatmul.mubr.msk.f32.gmra.mxu1 %vm752_vm3, %v1803_v24 }
 0x2df   : >> { %3216 = vmatprep.mubr.msk.f32.mxu1 %vm3663_vm2, %v4791_v56 }
 0x2e2   : >> { %3217 = vmatmul.mubr.msk.f32.gmra.mxu1 %vm752_vm3, %v1805_v19 }
 0x2e3   : >> { %3219 = vmatprep.mubr.msk.f32.mxu1 %vm3663_vm2, %v4791_v56 }
 0x2e6   : >> { %3220 = vmatmul.mubr.msk.f32.gmra.mxu1 %vm752_vm3, %v1807_v27 }
 0x2e7   : >> { %3265 = vmatprep.mubr.msk.f32.mxu1 %vm3663_vm2, %v4791_v56 }
 0x301   : >> { %v833_v28 = vpop.f32.mrf.mxu1 }
 0x302   : >> { %v4046_v29 = vadd.f32 %v833_v28, %v4808_v7 }
 0x303   : >> { %v3029_v30 = vpop.f32.mrf.mxu1 }
 0x304   : >> { %v868_v31 = vsel %vm867_vm4, %v4046_v29, -inf }
 0x305   : >> { %869 = vmax.xlane.f32.xlu0 %v868_v31  ;;  %v838_v32 = vpop.f32.mrf.mxu1 }
 0x306   : >> { %v4051_v34 = vadd.f32 %v838_v32, %v4807_v8 }
 0x307   : >> { %v3032_v36 = vpop.f32.mrf.mxu1 }
 0x308   : >> { %v871_v37 = vsel %vm867_vm4, %v4051_v34, -inf }
 0x309   : >> { %872 = vmax.xlane.f32.xlu1 %v871_v37  ;;  %v843_v38 = vpop.f32.mrf.mxu1 }
 0x30a   : >> { %v4056_v39 = vadd.f32 %v843_v38, %v4806_v9 }
 0x30b   : >> { %v3035_v40 = vpop.f32.mrf.mxu1 }
 0x30c   : >> { %v874_v41 = vsel %vm867_vm4, %v4056_v39, -inf }
 0x30d   : >> { %875 = vmax.xlane.f32.xlu0 %v874_v41  ;;  %v848_v42 = vpop.f32.mrf.mxu1 }
 0x30e   : >> { %v4061_v44 = vadd.f32 %v848_v42, %v4805_v10 }
 0x30f   : >> { %v3038_v46 = vpop.f32.mrf.mxu1 }
 0x310   : >> { %v877_v47 = vsel %vm867_vm4, %v4061_v44, -inf }
 0x311   : >> { %878 = vmax.xlane.f32.xlu0 %v877_v47  ;;  %v853_v48 = vpop.f32.mrf.mxu1 }
 0x312   : >> { %v4066_v49 = vadd.f32 %v853_v48, %v4804_v11 }
 0x313   : >> { %v3041_v50 = vpop.f32.mrf.mxu1 }
 0x314   : >> { %v880_v52 = vsel %vm867_vm4, %v4066_v49, -inf }
 0x315   : >> { %881 = vmax.xlane.f32.xlu0 %v880_v52  ;;  %v858_v53 = vpop.f32.mrf.mxu1 }
 0x316   : >> { %v4071_v25 = vadd.f32 %v858_v53, %v3738_v12 }
 0x317   : >> { %v3044_v54 = vpop.f32.mrf.mxu1 }
 0x318   : >> { %v883_v55 = vsel %vm867_vm4, %v4071_v25, -inf }
 0x319   : >> { %884 = vmax.xlane.f32.xlu1 %v883_v55  ;;  %v863_v33 = vpop.f32.mrf.mxu1 }
 0x31a   : >> { %v4076_v57 = vadd.f32 %v863_v33, %v3740_v13 }
 0x31b   : >> { %v3047_v26 = vpop.f32.mrf.mxu1 }
 0x31c   : >> { %v887_v58 = vsel %vm886_vm5, %v4076_v57, -inf }
 0x31d   : >> { %888 = vmax.xlane.f32.xlu0 %v887_v58 }
 0x352   : >> { %v4080_v59 = vpop.f32.mrf.mxu0  ;;  %v1172_v60 = vpop.f32.mrf.mxu1 }
 0x353   : >> { %v4083_v35 = vadd.f32 %v1172_v60, %v4808_v7  ;;  %1254 = vrot.lane.b32.xlu0 %v4080_v59, %s3665_s18 }
 0x354   : >> { %v3006_v61 = vpop.f32.mrf.mxu0  ;;  %v3087_v43 = vpop.f32.mrf.mxu1 }
 0x355   : >> { %v1206_v62 = vsel %vm867_vm4, %v4083_v35, -inf }
 0x356   : >> { %1207 = vmax.xlane.f32.xlu1 %v1206_v62  ;;  %v4089_v63 = vpop.f32.mrf.mxu0  ;;  %v1177_v14 = vpop.f32.mrf.mxu1 }
 0x357   : >> { %1609 = vrot.lane.b32.xlu0 %v4080_v59, %s3668_s21  ;;  %v4137_v50 = vadd.f32 %v1177_v14, %v4807_v8 }
 0x358   : >> { %v3009_v45 = vpop.f32.mrf.mxu0  ;;  %v3090_v51 = vpop.f32.mrf.mxu1 }
 0x359   : >> { %v1209_v54 = vsel %vm867_vm4, %v4137_v50, -inf }
 0x35a   : >> { %v4093_v15 = vpop.f32.mrf.mxu0  ;;  %v1182_v16 = vpop.f32.mrf.mxu1 }
 0x35b   : >> { %1256 = vrot.lane.b32.xlu0 %v4089_v63, %s3665_s18  ;;  %v4150_v43 = vadd.f32 %v1182_v16, %v4806_v9 }
 0x35c   : >> { %v3012_v17 = vpop.f32.mrf.mxu0  ;;  %v3093_v18 = vpop.f32.mrf.mxu1 }
 0x35d   : >> { %v1212_v18 = vsel %vm867_vm4, %v4150_v43, -inf }
 0x35e   : >> { %v4097_v19 = vpop.f32.mrf.mxu0  ;;  %v4099_v20 = vpop.f32.mrf.mxu1 }
 0x35f   : >> { %1611 = vrot.lane.b32.xlu0 %v4089_v63, %s3668_s21 }
 0x360   : >> { %v3015_v21 = vpop.f32.mrf.mxu0  ;;  %v3096_v22 = vpop.f32.mrf.mxu1 }
 0x362   : >> { %v4103_v23 = vpop.f32.mrf.mxu0  ;;  %v1192_v24 = vpop.f32.mrf.mxu1 }
 0x363   : >> { %v4155_v45 = vadd.f32 %v1192_v24, %v4804_v11 }
 0x364   : >> { %v3018_v27 = vpop.f32.mrf.mxu0  ;;  %v3099_v28 = vpop.f32.mrf.mxu1 }
 0x366   : >> { %v4105_v30 = vpop.f32.mrf.mxu0  ;;  %v4107_v31 = vpop.f32.mrf.mxu1 }
 0x367   : >> { %1258 = vrot.lane.b32.xlu1 %v4093_v15, %s3665_s18 }
 0x368   : >> { %v3021_v32 = vpop.f32.mrf.mxu0  ;;  %v3102_v36 = vpop.f32.mrf.mxu1 }
 0x369   : >> { %v1218_v32 = vsel %vm867_vm4, %v4155_v45, -inf }
 0x36a   : >> { %v4111_v37 = vpop.f32.mrf.mxu0 }
 0x36b   : >> { %1613 = vrot.lane.b32.xlu1 %v4093_v15, %s3668_s21  ;;  %3049 = vmatpush3.msk.msra.mxu0 %vm932_vm6, %v4111_v37 }
 0x36c   : >> { %v3024_v38 = vpop.f32.mrf.mxu0  ;;  %3050 = vmatprep.subr.mxu0 %v4791_v56 }
 0x36d   : >> { %3051 = vmatpush3.msra.mxu0 %v4105_v30 }
 0x36e   : >> { %3052 = vmatprep.subr.mxu0 %v4791_v56  ;;  %v4120_v40 = vpop.f32.mrf.mxu1 }
 0x36f   : >> { %3053 = vmatpush3.msra.mxu0 %v4103_v23 }
 0x370   : >> { %3054 = vmatprep.subr.mxu0 %v4791_v56  ;;  %v3105_v41 = vpop.f32.mrf.mxu1 }
 0x371   : >> { %3055 = vmatpush3.msra.mxu0 %v4097_v19 }
 0x372   : >> { %3056 = vmatprep.subr.mxu0 %v4791_v56  ;;  %v4126_v42 = vpop.f32.mrf.mxu1 }
 0x373   : >> { %3057 = vmatpush3.msra.mxu0 %v4093_v15 }
 0x374   : >> { %3058 = vmatprep.subr.mxu0 %v4791_v56  ;;  %v3145_v46 = vpop.f32.mrf.mxu1 }
 0x375   : >> { %3059 = vmatpush3.msra.mxu0 %v4089_v63 }
 0x376   : >> { %3060 = vmatprep.subr.mxu0 %v4791_v56  ;;  %v4132_v47 = vpop.f32.mrf.mxu1 }
 0x377   : >> { %3061 = vmatpush3.msra.mxu0 %v4080_v59 }
 0x378   : >> { %v3148_v48 = vpop.f32.mrf.mxu1  ;;  %3106 = vmatprep.subr.mxu0 %v4791_v56 }
 0x37a   : >> { %v4139_v52 = vpop.f32.mrf.mxu1 }
 0x37c   : >> { %v3151_v53 = vpop.f32.mrf.mxu1 }
 0x37e   : >> { %1210 = vmax.xlane.f32.xlu0 %v1209_v54  ;;  %v4143_v55 = vpop.f32.mrf.mxu1 }
 0x380   : >> { %v3154_v33 = vpop.f32.mrf.mxu1 }
 0x382   : >> { %v4145_v26 = vpop.f32.mrf.mxu1 }
 0x384   : >> { %v3157_v58 = vpop.f32.mrf.mxu1 }
 0x386   : >> { %v4147_v60 = vpop.f32.mrf.mxu1 }
 0x388   : >> { %v3160_v61 = vpop.f32.mrf.mxu1 }
 0x38a   : >> { %v4152_v62 = vpop.f32.mrf.mxu1 }
 0x38c   : >> { %v3163_v14 = vpop.f32.mrf.mxu1 }
 0x38e   : >> { %v870_v51 = vpop.xlane.xlu0 %869  ;;  %v4157_v17 = vpop.f32.mrf.mxu1 }
 0x38f   : >> { %v890_v21 = vsub.f32 %v4046_v29, %v870_v51  ;;  %1213 = vmax.xlane.f32.xlu1 %v1212_v18 }
 0x390   : >> { %v3203_v22 = vpop.f32.mrf.mxu1 }
 0x391   : >> { %v897_v27 = vmul.f32 1.442695, %v890_v21 }
 0x392   : >> { %v873_v28 = vpop.xlane.xlu1 %872  ;;  %v4162_v16 = vpop.f32.mrf.mxu1 }
 0x393   : >> { %3431 = vpow2.f32 %v897_v27  ;;  %v891_v24 = vsub.f32 %v4051_v34, %v873_v28  ;;  %1219 = vmax.xlane.f32.xlu1 %v1218_v32 }
 0x394   : >> { %1260 = vrot.lane.b32.xlu0 %v4097_v19, %s3665_s18  ;;  %v3206_v36 = vpop.f32.mrf.mxu1 }
 0x395   : >> { %v899_v38 = vmul.f32 1.442695, %v891_v24 }
 0x396   : >> { %v876_v41 = vpop.xlane.xlu0 %875  ;;  %v4169_v29 = vpop.f32.mrf.mxu1 }
 0x397   : >> { %3433 = vpow2.f32 %v899_v38  ;;  %v892_v46 = vsub.f32 %v4056_v39, %v876_v41 }
 0x398   : >> { %1615 = vrot.lane.b32.xlu0 %v4097_v19, %s3668_s21  ;;  %v3209_v48 = vpop.f32.mrf.mxu1 }
 0x399   : >> { %v901_v53 = vmul.f32 1.442695, %v892_v46 }
 0x39a   : >> { %v879_v54 = vpop.xlane.xlu0 %878  ;;  %v4174_v33 = vpop.f32.mrf.mxu1 }
 0x39b   : >> { %3435 = vpow2.f32 %v901_v53  ;;  %v893_v34 = vsub.f32 %v4061_v44, %v879_v54  ;;  %v4222_v54 = vadd.f32 %v4099_v20, %v4805_v10  ;;  %v4242_v20 = vadd.f32 %v4107_v31, %v3738_v12 }
 0x39c   : >> { %v3212_v58 = vpop.f32.mrf.mxu1  ;;  %v4268_v31 = vadd.f32 %v4120_v40, %v3740_v13 }
 0x39d   : >> { %v903_v61 = vmul.f32 1.442695, %v893_v34 }
 0x39e   : >> { %v882_v14 = vpop.xlane.xlu0 %881  ;;  %v4177_v51 = vpop.f32.mrf.mxu1 }
 0x39f   : >> { %3437 = vpow2.f32 %v903_v61  ;;  %v894_v18 = vsub.f32 %v4066_v49, %v882_v14  ;;  %v4248_v61 = vadd.f32 %v4126_v42, %v4808_v7  ;;  %v1221_v14 = vsel %vm867_vm4, %v4242_v20, -inf }
 0x3a0   : >> { %v4180_v39 = vpop.eup %3431  ;;  %v3215_v21 = vpop.f32.mrf.mxu1  ;;  %v4272_v42 = vadd.f32 %v4132_v47, %v4807_v8  ;;  %v4290_v47 = vadd.f32 %v4145_v26, %v4804_v11 }
 0x3a1   : >> { %v905_v22 = vmul.f32 1.442695, %v894_v18  ;;  %3063 = vmatmul.mubr.msk.f32.vlgmr.msra.gmra.mxu0 %vm867_vm4, %v4180_v39  ;;  %v1567_v18 = vsel %vm867_vm4, %v4248_v61, -inf }
 0x3a2   : >> { %v885_v27 = vpop.xlane.xlu1 %884  ;;  %v4184_v28 = vpop.f32.mrf.mxu1  ;;  %3065 = vmatprep.mubr.msk.f32.mxu0 %vm3663_vm2, %v4791_v56  ;;  %v1570_v21 = vsel %vm867_vm4, %v4272_v42, -inf }
 0x3a3   : >> { %3439 = vpow2.f32 %v905_v22  ;;  %v895_v44 = vsub.f32 %v4071_v25, %v885_v27  ;;  %v4302_v27 = vadd.f32 %v4157_v17, %v4808_v7  ;;  %v4318_v17 = vadd.f32 %v4174_v33, %v4805_v10 }
 0x3a4   : >> { %v4189_v32 = vpop.eup %3433  ;;  %1264 = vrot.lane.b32.xlu1 %v4105_v30, %s3665_s18  ;;  %v3218_v49 = vpop.f32.mrf.mxu1 }
 0x3a5   : >> { %v907_v24 = vmul.f32 1.442695, %v895_v44  ;;  %3066 = vmatmul.mubr.msk.f32.gmra.mxu0 %vm867_vm4, %v4189_v32  ;;  %v4308_v44 = vadd.f32 %v4169_v29, %v4806_v9  ;;  %v4324_v29 = vadd.f32 %v4177_v51, %v4804_v11 }
 0x3a6   : >> { %v889_v36 = vpop.xlane.xlu0 %888  ;;  %v4195_v38 = vpop.f32.mrf.mxu1  ;;  %3068 = vmatprep.mubr.msk.f32.mxu0 %vm3663_vm2, %v4791_v56 }
 0x3a7   : >> { %3441 = vpow2.f32 %v907_v24  ;;  %v896_v41 = vsub.f32 %v4076_v57, %v889_v36  ;;  %v1928_v24 = vsel %vm867_vm4, %v4308_v44, -inf  ;;  %v1934_v33 = vsel %vm867_vm4, %v4324_v29, -inf }
 0x3a8   : >> { %v4200_v25 = vpop.eup %3435  ;;  %1619 = vrot.lane.b32.xlu1 %v4105_v30, %s3668_s21  ;;  %v3221_v46 = vpop.f32.mrf.mxu1 }
 0x3a9   : >> { %v909_v48 = vmul.f32 1.442695, %v896_v41  ;;  %3069 = vmatmul.mubr.msk.f32.gmra.mxu0 %vm867_vm4, %v4200_v25  ;;  %v1931_v41 = vsel %vm867_vm4, %v4318_v17, -inf }
 0x3aa   : >> { %3071 = vmatprep.mubr.msk.f32.mxu0 %vm3663_vm2, %v4791_v56 }
 0x3ab   : >> { %3443 = vpow2.f32 %v909_v48 }
 0x3ac   : >> { %v4208_v53 = vpop.eup %3437  ;;  %1974 = vrot.lane.b32.xlu1 %v4105_v30, %s3669_s22  ;;  %v1215_v30 = vsel %vm867_vm4, %v4222_v54, -inf }
 0x3ad   : >> { %3072 = vmatmul.mubr.msk.f32.gmra.mxu0 %vm867_vm4, %v4208_v53 }
 0x3ae   : >> { %3074 = vmatprep.mubr.msk.f32.mxu0 %vm3663_vm2, %v4791_v56 }
 0x3b0   : >> { %v4216_v57 = vpop.eup %3439 }
 0x3b1   : >> { %3075 = vmatmul.mubr.msk.f32.gmra.mxu0 %vm867_vm4, %v4216_v57 }
 0x3b2   : >> { %3077 = vmatprep.mubr.msk.f32.mxu0 %vm3663_vm2, %v4791_v56 }
 0x3b4   : >> { %v4226_v34 = vpop.eup %3441 }
 0x3b5   : >> { %3078 = vmatmul.mubr.msk.f32.gmra.mxu0 %vm867_vm4, %v4226_v34 }
 0x3b6   : >> { %3080 = vmatprep.mubr.msk.f32.mxu0 %vm3663_vm2, %v4791_v56 }
 0x3b7   : >> { %1216 = vmax.xlane.f32.xlu0 %v1215_v30 }
 0x3b8   : >> { %v4234_v58 = vpop.eup %3443 }
 0x3b9   : >> { %3081 = vmatmul.mubr.msk.f32.gmra.mxu0 %vm867_vm4, %v4234_v58 }
 0x3ba   : >> { %3120 = vmatprep.mubr.msk.f32.mxu0 %vm3663_vm2, %v4791_v56 }
 0x3c5   : >> { %v4312_v49 = vpop.permute.xlu0 %1254 }
 0x3c9   : >> { %v4326_v36 = vpop.permute.xlu0 %1609 }
 0x3cd   : >> { %1262 = vrot.lane.b32.xlu0 %v4103_v23, %s3665_s18  ;;  %v1257_v46 = vpop.permute.xlu0 %1256 }
 0x3d0   : >> { %1222 = vmax.xlane.f32.xlu1 %v1221_v14 }
 0x3d1   : >> { %1617 = vrot.lane.b32.xlu0 %v4103_v23, %s3668_s21  ;;  %v4338_v51 = vpop.permute.xlu0 %1611 }
 0x3d4   : >> { %1568 = vmax.xlane.f32.xlu1 %v1567_v18 }
 0x3d5   : >> { %1972 = vrot.lane.b32.xlu0 %v4103_v23, %s3669_s22  ;;  %v1224_v23 = vsel %vm886_vm5, %v4268_v31, -inf }
 0x3d9   : >> { %1266 = vrot.lane.b32.xlu0 %v4111_v37, %s3665_s18 }
 0x3dd   : >> { %1621 = vrot.lane.b32.xlu0 %v4111_v37, %s3668_s21 }
 0x3df   : >> { %v1208_v30 = vpop.xlane.xlu1 %1207 }
 0x3e1   : >> { %1976 = vrot.lane.b32.xlu0 %v4111_v37, %s3669_s22  ;;  %v4280_v37 = vadd.f32 %v4139_v52, %v4806_v9  ;;  %v4296_v52 = vadd.f32 %v4147_v60, %v3738_v12  ;;  %v1922_v60 = vsel %vm867_vm4, %v4302_v27, -inf }
 0x3e3   : >> { %v1573_v40 = vsel %vm867_vm4, %v4280_v37, -inf  ;;  %v1582_v26 = vsel %vm867_vm4, %v4296_v52, -inf  ;;  %v1259_v18 = vpop.permute.xlu1 %1258 }
 0x3e5   : >> { %1968 = vrot.lane.b32.xlu1 %v4093_v15, %s3669_s22  ;;  %v4284_v15 = vadd.f32 %v4143_v55, %v4805_v10  ;;  %v1579_v55 = vsel %vm867_vm4, %v4290_v47, -inf }
 0x3e7   : >> { %v1576_v22 = vsel %vm867_vm4, %v4284_v15, -inf }
 0x400   : >> { %1225 = vmax.xlane.f32.xlu0 %v1224_v23  ;;  %v4342_v23 = vadd.f32 %v4152_v62, %v3740_v13 }
 0x404   : >> { %1571 = vmax.xlane.f32.xlu0 %v1570_v21  ;;  %v4346_v21 = vadd.f32 %v4162_v16, %v4807_v8 }
 0x407   : >> { %v1211_v14 = vpop.xlane.xlu0 %1210 }
 0x409   : >> { %1574 = vmax.xlane.f32.xlu1 %v1573_v40  ;;  %v1585_v40 = vsel %vm886_vm5, %v4342_v23, -inf }
 0x40d   : >> { %1577 = vmax.xlane.f32.xlu1 %v1576_v22  ;;  %v4350_v22 = vpop.permute.xlu1 %1613 }
 0x411   : >> { %1580 = vmax.xlane.f32.xlu1 %v1579_v55  ;;  %v4356_v55 = vadd.f32 %v4195_v38, %v3740_v13  ;;  %v1228_v38 = vsub.f32 %v4137_v50, %v1211_v14 }
 0x413   : >> { %v1236_v8 = vmul.f32 1.442695, %v1228_v38 }
 0x415   : >> { %1583 = vmax.xlane.f32.xlu1 %v1582_v26  ;;  %v1925_v26 = vsel %vm867_vm4, %v4346_v21, -inf }
 0x418   : >> { %v1214_v16 = vpop.xlane.xlu1 %1213 }
 0x419   : >> { %1923 = vmax.xlane.f32.xlu1 %v1922_v60  ;;  %v1229_v9 = vsub.f32 %v4150_v43, %v1214_v16 }
 0x41a   : >> { %1970 = vrot.lane.b32.xlu0 %v4097_v19, %s3669_s22  ;;  %v4332_v19 = vadd.f32 %v4184_v28, %v3738_v12  ;;  %v1261_v28 = vpop.permute.xlu0 %1260 }
 0x41b   : >> { %v1238_v11 = vmul.f32 1.442695, %v1229_v9 }
 0x41c   : >> { %v1937_v48 = vsel %vm867_vm4, %v4332_v19, -inf }
 0x41d   : >> { %1929 = vmax.xlane.f32.xlu1 %v1928_v24  ;;  %v1940_v24 = vsel %vm886_vm5, %v4356_v55, -inf }
 0x41e   : >> { %v4358_v62 = vpop.permute.xlu0 %1615 }
 0x421   : >> { %1932 = vmax.xlane.f32.xlu1 %v1931_v41  ;;  %v1220_v41 = vpop.xlane.xlu1 %1219 }
 0x422   : >> { %v1231_v50 = vsub.f32 %v4155_v45, %v1220_v41 }
 0x425   : >> { %1935 = vmax.xlane.f32.xlu1 %v1934_v33 }
 0x429   : >> { %1938 = vmax.xlane.f32.xlu1 %v1937_v48 }
 0x439   : >> { %1586 = vmax.xlane.f32.xlu0 %v1585_v40  ;;  %v1265_v40 = vpop.permute.xlu1 %1264 }
 0x43a   : >> { %1964 = vrot.lane.b32.xlu1 %v4080_v59, %s3669_s22  ;;  %v1227_v59 = vsub.f32 %v4083_v35, %v1208_v30  ;;  %v4809_v35 = vmov 0.0  }
 0x43c   : >> { %v1234_v56 = vmul.f32 1.442695, %v1227_v59 }
 0x43d   : >> { %1926 = vmax.xlane.f32.xlu0 %v1925_v26  ;;  %v1620_v26 = vpop.permute.xlu1 %1619 }
 0x43e   : >> { %3445 = vpow2.f32 %v1234_v56 }
 0x43f   : >> { %3447 = vpow2.f32 %v1236_v8  ;;  %v1242_v8 = vmul.f32 1.442695, %v1231_v50 }
 0x440   : >> { %v1217_v60 = vpop.xlane.xlu0 %1216  ;;  %3449 = vpow2.f32 %v1238_v11 }
 0x441   : >> { %1941 = vmax.xlane.f32.xlu0 %v1940_v24  ;;  %v1230_v24 = vsub.f32 %v4222_v54, %v1217_v60  ;;  %v4374_v30 = vpop.permute.xlu1 %1974 }
 0x443   : >> { %v1240_v43 = vmul.f32 1.442695, %v1230_v24  ;;  %v1039_v24 = vsel %vm867_vm4, %v4189_v32, 0.0  ;;  %v1051_v32 = vsel %vm867_vm4, %v4226_v34, 0.0 }
 0x444   : >> { %v1263_v33 = vpop.permute.xlu0 %1262 }
 0x445   : >> { %3451 = vpow2.f32 %v1240_v43 }
 0x446   : >> { %3453 = vpow2.f32 %v1242_v8  ;;  %v1042_v8 = vsel %vm867_vm4, %v4200_v25, 0.0  ;;  %v1054_v25 = vsel %vm886_vm5, %v4234_v58, 0.0 }
 0x448   : >> { %v1618_v48 = vpop.permute.xlu0 %1617 }
 0x44b   : >> { %v4383_v11 = vpop.eup %3445 }
 0x44c   : >> { %v4366_v7 = vpop.permute.xlu0 %1972  ;;  %v3448_v45 = vpop.eup %3447 }
 0x450   : >> { %v1267_v10 = vpop.permute.xlu0 %1266 }
 0x451   : >> { %3107 = vmatpush3.msk.msra.mxu0 %vm932_vm6, %v1267_v10 }
 0x452   : >> { %3108 = vmatprep.subr.mxu0 %v4809_v35 }
 0x453   : >> { %3109 = vmatpush3.msra.mxu0 %v1265_v40 }
 0x454   : >> { %3110 = vmatprep.subr.mxu0 %v4809_v35  ;;  %v1622_v54 = vpop.permute.xlu0 %1621 }
 0x455   : >> { %3111 = vmatpush3.msra.mxu0 %v1263_v33 }
 0x456   : >> { %3112 = vmatprep.subr.mxu0 %v4809_v35 }
 0x457   : >> { %1966 = vrot.lane.b32.xlu0 %v4089_v63, %s3669_s22  ;;  %3113 = vmatpush3.msra.mxu0 %v1261_v28  ;;  %v1036_v63 = vsel %vm867_vm4, %v4180_v39, 0.0  ;;  %v1400_v39 = vsel %vm867_vm4, %v3448_v45, 0.0 }
 0x458   : >> { %3114 = vmatprep.subr.mxu0 %v4809_v35 }
 0x459   : >> { %3115 = vmatpush3.msra.mxu0 %v1259_v18  ;;  %v1223_v9 = vpop.xlane.xlu1 %1222 }
 0x45a   : >> { %v1232_v10 = vsub.f32 %v4242_v20, %v1223_v9  ;;  %3116 = vmatprep.subr.mxu0 %v4809_v35 }
 0x45b   : >> { %3117 = vmatpush3.msra.mxu0 %v1257_v46 }
 0x45c   : >> { %3118 = vmatprep.subr.mxu0 %v4809_v35  ;;  %v1244_v56 = vmul.f32 1.442695, %v1232_v10  ;;  %v1045_v10 = vsel %vm867_vm4, %v4208_v53, 0.0 }
 0x45d   : >> { %3119 = vmatpush3.msra.mxu0 %v4312_v49  ;;  %v3450_v49 = vpop.eup %3449 }
 0x45e   : >> { %1037 = vadd.xlane.f32.xlu1 %v1036_v63  ;;  %3121 = vmatmul.mubr.msk.f32.vlgmr.msra.gmra.mxu0 %vm867_vm4, %v4383_v11  ;;  %3455 = vpow2.f32 %v1244_v56  ;;  %v1403_v18 = vsel %vm867_vm4, %v3450_v49, 0.0  ;;  %v3452_v28 = vpop.eup %3451  ;;  %v1048_v56 = vsel %vm867_vm4, %v4216_v57, 0.0  ;;  %v1977_v63 = vpop.permute.xlu0 %1976  ;;  %v1397_v57 = vsel %vm867_vm4, %v4383_v11, 0.0 }
 0x45f   : >> { %3164 = vmatprep.subr.mxu0 %v4809_v35  ;;  %3123 = vmatprep.mubr.msk.f32.mxu0 %vm3663_vm2, %v4809_v35  ;;  %v1406_v41 = vsel %vm867_vm4, %v3452_v28, 0.0  ;;  %v3454_v33 = vpop.eup %3453 }
 0x460   : >> { %3165 = vmatpush3.msk.msra.mxu0 %vm932_vm6, %v1622_v54  ;;  %v1409_v59 = vsel %vm867_vm4, %v3454_v33, 0.0 }
 0x461   : >> { %v4394_v20 = vpop.f32.mrf.mxu0  ;;  %3166 = vmatprep.subr.mxu0 %v4809_v35 }
 0x462   : >> { %3167 = vmatpush3.msra.mxu0 %v1620_v26  ;;  %1401 = vadd.xlane.f32.xlu1 %v1400_v39 }
 0x463   : >> { %v3064_v46 = vpop.f32.mrf.mxu0  ;;  %3124 = vmatmul.mubr.msk.f32.gmra.mxu0 %vm867_vm4, %v3448_v45  ;;  %3168 = vmatprep.subr.mxu0 %v4809_v35  ;;  %v1569_v45 = vpop.xlane.xlu1 %1568 }
 0x464   : >> { %3169 = vmatpush3.msra.mxu0 %v1618_v48  ;;  %3126 = vmatprep.mubr.msk.f32.mxu0 %vm3663_vm2, %v4809_v35  ;;  %v1588_v54 = vsub.f32 %v4248_v61, %v1569_v45 }
 0x465   : >> { %v4402_v14 = vpop.f32.mrf.mxu0  ;;  %3170 = vmatprep.subr.mxu0 %v4809_v35 }
 0x466   : >> { %3171 = vmatpush3.msra.mxu0 %v4358_v62  ;;  %1404 = vadd.xlane.f32.xlu1 %v1403_v18  ;;  %v1595_v53 = vmul.f32 1.442695, %v1588_v54 }
 0x467   : >> { %v3067_v16 = vpop.f32.mrf.mxu0  ;;  %3127 = vmatmul.mubr.msk.f32.gmra.mxu0 %vm867_vm4, %v3450_v49  ;;  %3172 = vmatprep.subr.mxu0 %v4809_v35 }
 0x468   : >> { %3173 = vmatpush3.msra.mxu0 %v4350_v22  ;;  %3129 = vmatprep.mubr.msk.f32.mxu0 %vm3663_vm2, %v4809_v35 }
 0x469   : >> { %v4412_v60 = vpop.f32.mrf.mxu0  ;;  %3174 = vmatprep.subr.mxu0 %v4809_v35 }
 0x46a   : >> { %3175 = vmatpush3.msra.mxu0 %v4338_v51  ;;  %1407 = vadd.xlane.f32.xlu1 %v1406_v41 }
 0x46b   : >> { %v3070_v62 = vpop.f32.mrf.mxu0  ;;  %3130 = vmatmul.mubr.msk.f32.gmra.mxu0 %vm867_vm4, %v3452_v28  ;;  %3176 = vmatprep.subr.mxu0 %v4809_v35  ;;  %v3456_v48 = vpop.eup %3455 }
 0x46c   : >> { %3177 = vmatpush3.msra.mxu0 %v4326_v36  ;;  %3132 = vmatprep.mubr.msk.f32.mxu0 %vm3663_vm2, %v4809_v35  ;;  %v1412_v36 = vsel %vm867_vm4, %v3456_v48, 0.0  ;;  %v1969_v28 = vpop.permute.xlu1 %1968 }
 0x46d   : >> { %v4422_v22 = vpop.f32.mrf.mxu0  ;;  %3222 = vmatprep.subr.mxu0 %v4809_v35 }
 0x46e   : >> { %1410 = vadd.xlane.f32.xlu1 %v1409_v59 }
 0x46f   : >> { %v3073_v51 = vpop.f32.mrf.mxu0  ;;  %3133 = vmatmul.mubr.msk.f32.gmra.mxu0 %vm867_vm4, %v3454_v33 }
 0x470   : >> { %3135 = vmatprep.mubr.msk.f32.mxu0 %vm3663_vm2, %v4809_v35 }
 0x471   : >> { %v4429_v38 = vpop.f32.mrf.mxu0 }
 0x472   : >> { %1413 = vadd.xlane.f32.xlu1 %v1412_v36 }
 0x473   : >> { %v3076_v40 = vpop.f32.mrf.mxu0  ;;  %3136 = vmatmul.mubr.msk.f32.gmra.mxu0 %vm867_vm4, %v3456_v48 }
 0x474   : >> { %3138 = vmatprep.mubr.msk.f32.mxu0 %vm3663_vm2, %v4809_v35 }
 0x475   : >> { %v4435_v26 = vpop.f32.mrf.mxu0 }
 0x476   : >> { %1040 = vadd.xlane.f32.xlu0 %v1039_v24 }
 0x477   : >> { %v3079_v50 = vpop.f32.mrf.mxu0 }
 0x479   : >> { %v4439_v43 = vpop.f32.mrf.mxu0 }
 0x47a   : >> { %1043 = vadd.xlane.f32.xlu0 %v1042_v8 }
 0x47b   : >> { %v3082_v9 = vpop.f32.mrf.mxu0 }
 0x47e   : >> { %1046 = vadd.xlane.f32.xlu0 %v1045_v10 }
 0x482   : >> { %1049 = vadd.xlane.f32.xlu0 %v1048_v56 }
 0x486   : >> { %1052 = vadd.xlane.f32.xlu0 %v1051_v32 }
 0x489   : >> { %v1226_v39 = vpop.xlane.xlu0 %1225 }
 0x48a   : >> { %v1233_v49 = vsub.f32 %v4268_v31, %v1226_v39  ;;  %1055 = vadd.xlane.f32.xlu0 %v1054_v25 }
 0x48c   : >> { %v1246_v46 = vmul.f32 1.442695, %v1233_v49 }
 0x48d   : >> { %v1572_v18 = vpop.xlane.xlu0 %1571 }
 0x48e   : >> { %3457 = vpow2.f32 %v1246_v46  ;;  %v1589_v34 = vsub.f32 %v4272_v42, %v1572_v18  ;;  %1398 = vadd.xlane.f32.xlu0 %v1397_v57 }
 0x48f   : >> { %3459 = vpow2.f32 %v1595_v53 }
 0x490   : >> { %v1597_v61 = vmul.f32 1.442695, %v1589_v34 }
 0x491   : >> { %v1971_v56 = vpop.permute.xlu0 %1970 }
 0x492   : >> { %v1575_v16 = vpop.xlane.xlu1 %1574  ;;  %3461 = vpow2.f32 %v1597_v61 }
 0x493   : >> { %v1590_v41 = vsub.f32 %v4280_v37, %v1575_v16 }
 0x495   : >> { %v1599_v58 = vmul.f32 1.442695, %v1590_v41 }
 0x496   : >> { %v1578_v31 = vpop.xlane.xlu1 %1577 }
 0x497   : >> { %v1591_v33 = vsub.f32 %v4284_v15, %v1578_v31  ;;  %3463 = vpow2.f32 %v1599_v58 }
 0x499   : >> { %v1601_v62 = vmul.f32 1.442695, %v1591_v33 }
 0x49a   : >> { %v1581_v59 = vpop.xlane.xlu1 %1580 }
 0x49b   : >> { %v3458_v48 = vpop.eup %3457  ;;  %v1592_v11 = vsub.f32 %v4290_v47, %v1581_v59  ;;  %3465 = vpow2.f32 %v1601_v62 }
 0x49c   : >> { %3139 = vmatmul.mubr.msk.f32.gmra.mxu0 %vm867_vm4, %v3458_v48  ;;  %v1415_v42 = vsel %vm886_vm5, %v3458_v48, 0.0  ;;  %v3460_v51 = vpop.eup %3459 }
 0x49d   : >> { %v1603_v36 = vmul.f32 1.442695, %v1592_v11  ;;  %1416 = vadd.xlane.f32.xlu1 %v1415_v42  ;;  %3178 = vmatprep.mubr.msk.f32.mxu0 %vm3663_vm2, %v4809_v35  ;;  %v1752_v40 = vsel %vm867_vm4, %v3460_v51, 0.0 }
 0x49e   : >> { %v1584_v37 = vpop.xlane.xlu1 %1583 }
 0x49f   : >> { %v1593_v15 = vsub.f32 %v4296_v52, %v1584_v37  ;;  %3467 = vpow2.f32 %v1603_v36  ;;  %v3462_v47 = vpop.eup %3461 }
 0x4a0   : >> { %3179 = vmatmul.mubr.msk.f32.vlgmr.msra.gmra.mxu0 %vm867_vm4, %v3460_v51  ;;  %v1755_v8 = vsel %vm867_vm4, %v3462_v47, 0.0 }
 0x4a1   : >> { %v1605_v24 = vmul.f32 1.442695, %v1593_v15  ;;  %3223 = vmatpush3.msk.msra.mxu0 %vm932_vm6, %v1977_v63  ;;  %1753 = vadd.xlane.f32.xlu1 %v1752_v40 }
 0x4a2   : >> { %3224 = vmatprep.subr.mxu0 %v4809_v35  ;;  %v1924_v50 = vpop.xlane.xlu1 %1923  ;;  %3181 = vmatprep.mubr.msk.f32.mxu0 %vm3663_vm2, %v4809_v35 }
 0x4a3   : >> { %3225 = vmatpush3.msra.mxu0 %v4374_v30  ;;  %v1943_v52 = vsub.f32 %v4302_v27, %v1924_v50  ;;  %3469 = vpow2.f32 %v1605_v24 }
 0x4a4   : >> { %3226 = vmatprep.subr.mxu0 %v4809_v35  ;;  %3182 = vmatmul.mubr.msk.f32.gmra.mxu0 %vm867_vm4, %v3462_v47  ;;  %v3464_v9 = vpop.eup %3463 }
 0x4a5   : >> { %v1950_v10 = vmul.f32 1.442695, %v1943_v52  ;;  %3227 = vmatpush3.msra.mxu0 %v4366_v7  ;;  %1756 = vadd.xlane.f32.xlu1 %v1755_v8  ;;  %v1758_v27 = vsel %vm867_vm4, %v3464_v9, 0.0 }
 0x4a6   : >> { %3228 = vmatprep.subr.mxu0 %v4809_v35  ;;  %3184 = vmatprep.mubr.msk.f32.mxu0 %vm3663_vm2, %v4809_v35  ;;  %v1930_v49 = vpop.xlane.xlu1 %1929 }
 0x4a7   : >> { %3471 = vpow2.f32 %v1950_v10  ;;  %3229 = vmatpush3.msra.mxu0 %v1971_v56 }
 0x4a8   : >> { %3230 = vmatprep.subr.mxu0 %v4809_v35  ;;  %3185 = vmatmul.mubr.msk.f32.gmra.mxu0 %vm867_vm4, %v3464_v9  ;;  %v3466_v30 = vpop.eup %3465 }
 0x4a9   : >> { %3231 = vmatpush3.msra.mxu0 %v1969_v28  ;;  %1759 = vadd.xlane.f32.xlu1 %v1758_v27  ;;  %v1761_v7 = vsel %vm867_vm4, %v3466_v30, 0.0  ;;  %v1945_v28 = vsub.f32 %v4308_v44, %v1930_v49 }
 0x4aa   : >> { %3187 = vmatprep.mubr.msk.f32.mxu0 %vm3663_vm2, %v4809_v35  ;;  %3232 = vmatprep.subr.mxu0 %v4809_v35  ;;  %v1933_v53 = vpop.xlane.xlu1 %1932 }
 0x4ab   : >> { %v1954_v41 = vmul.f32 1.442695, %v1945_v28  ;;  %v1946_v58 = vsub.f32 %v4318_v17, %v1933_v53 }
 0x4ac   : >> { %3188 = vmatmul.mubr.msk.f32.gmra.mxu0 %vm867_vm4, %v3466_v30  ;;  %v3468_v63 = vpop.eup %3467 }
 0x4ad   : >> { %1762 = vadd.xlane.f32.xlu1 %v1761_v7  ;;  %3190 = vmatprep.mubr.msk.f32.mxu0 %vm3663_vm2, %v4809_v35  ;;  %v1764_v45 = vsel %vm867_vm4, %v3468_v63, 0.0  ;;  %v1956_v59 = vmul.f32 1.442695, %v1946_v58 }
 0x4ae   : >> { %v1936_v57 = vpop.xlane.xlu1 %1935 }
 0x4af   : >> { %v1947_v48 = vsub.f32 %v4324_v29, %v1936_v57 }
 0x4b0   : >> { %3191 = vmatmul.mubr.msk.f32.gmra.mxu0 %vm867_vm4, %v3468_v63  ;;  %v3470_v32 = vpop.eup %3469 }
 0x4b1   : >> { %1765 = vadd.xlane.f32.xlu1 %v1764_v45  ;;  %3193 = vmatprep.mubr.msk.f32.mxu0 %vm3663_vm2, %v4809_v35  ;;  %v1767_v39 = vsel %vm867_vm4, %v3470_v32, 0.0  ;;  %v1958_v44 = vmul.f32 1.442695, %v1947_v48 }
 0x4b2   : >> { %v1939_v33 = vpop.xlane.xlu1 %1938 }
 0x4b4   : >> { %v3472_v54 = vpop.eup %3471  ;;  %3194 = vmatmul.mubr.msk.f32.gmra.mxu0 %vm867_vm4, %v3470_v32 }
 0x4b5   : >> { %1768 = vadd.xlane.f32.xlu1 %v1767_v39  ;;  %v2107_v25 = vsel %vm867_vm4, %v3472_v54, 0.0  ;;  %3196 = vmatprep.mubr.msk.f32.mxu0 %vm3663_vm2, %v4809_v35 }
 0x4b6   : >> { %2108 = vadd.xlane.f32.xlu0 %v2107_v25  ;;  %v1965_v11 = vpop.permute.xlu1 %1964 }
 0x4c2   : >> { %v1587_v46 = vpop.xlane.xlu0 %1586 }
 0x4c3   : >> { %v1594_v18 = vsub.f32 %v4342_v23, %v1587_v46 }
 0x4c5   : >> { %v1607_v34 = vmul.f32 1.442695, %v1594_v18 }
 0x4c6   : >> { %v1927_v61 = vpop.xlane.xlu0 %1926 }
 0x4c7   : >> { %3473 = vpow2.f32 %v1607_v34  ;;  %v1944_v16 = vsub.f32 %v4346_v21, %v1927_v61  ;;  %v1948_v21 = vsub.f32 %v4332_v19, %v1939_v33 }
 0x4c9   : >> { %v1952_v31 = vmul.f32 1.442695, %v1944_v16  ;;  %v1960_v42 = vmul.f32 1.442695, %v1948_v21 }
 0x4ca   : >> { %v1942_v62 = vpop.xlane.xlu0 %1941 }
 0x4cb   : >> { %3475 = vpow2.f32 %v1952_v31  ;;  %v1949_v51 = vsub.f32 %v4356_v55, %v1942_v62 }
 0x4cc   : >> { %3477 = vpow2.f32 %v1954_v41 }
 0x4cd   : >> { %3479 = vpow2.f32 %v1956_v59  ;;  %v1962_v37 = vmul.f32 1.442695, %v1949_v51 }
 0x4ce   : >> { %v1967_v23 = vpop.permute.xlu0 %1966  ;;  %3481 = vpow2.f32 %v1958_v44 }
 0x4cf   : >> { %3233 = vmatpush3.msra.mxu0 %v1967_v23  ;;  %3483 = vpow2.f32 %v1960_v42 }
 0x4d0   : >> { %3234 = vmatprep.subr.mxu0 %v4809_v35  ;;  %3485 = vpow2.f32 %v1962_v37 }
 0x4d1   : >> { %3235 = vmatpush3.msra.mxu0 %v1965_v11 }
 0x4d2   : >> { %3286 = vmatprep.subr.mxu0 %v4809_v35 }
 0x4d4   : >> { %v3474_v17 = vpop.eup %3473 }
 0x4d5   : >> { %3197 = vmatmul.mubr.msk.f32.gmra.mxu0 %vm867_vm4, %v3474_v17  ;;  %v1770_v29 = vsel %vm886_vm5, %v3474_v17, 0.0 }
 0x4d6   : >> { %1771 = vadd.xlane.f32.xlu1 %v1770_v29  ;;  %3236 = vmatprep.mubr.msk.f32.mxu0 %vm3663_vm2, %v4809_v35 }
 0x4d8   : >> { %v3476_v36 = vpop.eup %3475 }
 0x4d9   : >> { %3237 = vmatmul.mubr.msk.f32.vlgmr.msra.gmra.mxu0 %vm867_vm4, %v3472_v54  ;;  %v2110_v19 = vsel %vm867_vm4, %v3476_v36, 0.0  ;;  %v3478_v15 = vpop.eup %3477 }
 0x4da   : >> { %2111 = vadd.xlane.f32.xlu0 %v2110_v19  ;;  %3239 = vmatprep.mubr.msk.f32.mxu0 %vm3663_vm2, %v4809_v35  ;;  %v2113_v55 = vsel %vm867_vm4, %v3478_v15, 0.0  ;;  %v3480_v40 = vpop.eup %3479 }
 0x4db   : >> { %v2116_v47 = vsel %vm867_vm4, %v3480_v40, 0.0  ;;  %v3482_v24 = vpop.eup %3481 }
 0x4dc   : >> { %v2119_v50 = vsel %vm867_vm4, %v3482_v24, 0.0  ;;  %v3484_v52 = vpop.eup %3483 }
 0x4dd   : >> { %3240 = vmatmul.mubr.msk.f32.gmra.mxu0 %vm867_vm4, %v3476_v36  ;;  %v2122_v8 = vsel %vm867_vm4, %v3484_v52, 0.0  ;;  %v3486_v9 = vpop.eup %3485 }
 0x4de   : >> { %2114 = vadd.xlane.f32.xlu0 %v2113_v55  ;;  %3242 = vmatprep.mubr.msk.f32.mxu0 %vm3663_vm2, %v4809_v35  ;;  %v2125_v10 = vsel %vm886_vm5, %v3486_v9, 0.0 }
 0x4e1   : >> { %3243 = vmatmul.mubr.msk.f32.gmra.mxu0 %vm867_vm4, %v3478_v15 }
 0x4e2   : >> { %2117 = vadd.xlane.f32.xlu0 %v2116_v47  ;;  %3245 = vmatprep.mubr.msk.f32.mxu0 %vm3663_vm2, %v4809_v35 }
 0x4e5   : >> { %3246 = vmatmul.mubr.msk.f32.gmra.mxu0 %vm867_vm4, %v3480_v40 }
 0x4e6   : >> { %2120 = vadd.xlane.f32.xlu0 %v2119_v50  ;;  %3248 = vmatprep.mubr.msk.f32.mxu0 %vm3663_vm2, %v4809_v35 }
 0x4e7   : >> { %v1038_v46 = vpop.xlane.xlu1 %1037 }
 0x4e9   : >> { %3249 = vmatmul.mubr.msk.f32.gmra.mxu0 %vm867_vm4, %v3482_v24 }
 0x4ea   : >> { %2123 = vadd.xlane.f32.xlu0 %v2122_v8  ;;  %3251 = vmatprep.mubr.msk.f32.mxu0 %vm3663_vm2, %v4809_v35 }
 0x4eb   : >> { %v1402_v57 = vpop.xlane.xlu1 %1401 }
 0x4ed   : >> { %3252 = vmatmul.mubr.msk.f32.gmra.mxu0 %vm867_vm4, %v3484_v52 }
 0x4ee   : >> { %2126 = vadd.xlane.f32.xlu0 %v2125_v10  ;;  %3254 = vmatprep.mubr.msk.f32.mxu0 %vm3663_vm2, %v4809_v35 }
 0x4ef   : >> { %v1405_v61 = vpop.xlane.xlu1 %1404 }
 0x4f1   : >> { %3255 = vmatmul.mubr.msk.f32.gmra.mxu0 %vm867_vm4, %v3486_v9 }
 0x4f2   : >> { %3302 = vmatprep.mubr.msk.f32.mxu0 %vm3663_vm2, %v4809_v35 }
 0x4f3   : >> { %v1408_v33 = vpop.xlane.xlu1 %1407 }
 0x4f7   : >> { %v1411_v11 = vpop.xlane.xlu1 %1410 }
 0x4fb   : >> { %v1414_v51 = vpop.xlane.xlu1 %1413 }
 0x4ff   : >> { %v1041_v18 = vpop.xlane.xlu0 %1040 }
 0x503   : >> { %v1044_v34 = vpop.xlane.xlu0 %1043 }
 0x507   : >> { %v1047_v31 = vpop.xlane.xlu0 %1046 }
 0x50b   : >> { %v1050_v23 = vpop.xlane.xlu0 %1049 }
 0x50f   : >> { %v1053_v42 = vpop.xlane.xlu0 %1052 }
 0x513   : >> { %v1056_v15 = vpop.xlane.xlu0 %1055 }
 0x517   : >> { %v1399_v47 = vpop.xlane.xlu0 %1398 }
 0x518   : >> { %3487 = vrcp.f32 %v1399_v47 }
 0x519   : >> { %3489 = vrcp.f32 %v1038_v46 }
 0x51a   : >> { %3491 = vrcp.f32 %v1402_v57 }
 0x51e   : >> { %v4538_v56 = vpop.f32.mrf.mxu0 }
 0x520   : >> { %v3122_v27 = vpop.f32.mrf.mxu0 }
 0x523   : >> { %v4540_v30 = vpop.f32.mrf.mxu0 }
 0x525   : >> { %v3125_v7 = vpop.f32.mrf.mxu0 }
 0x526   : >> { %v4560_v37 = vpop.xlane.xlu1 %1416  ;;  %v3488_v7 = vpop.eup %3487 }
 0x527   : >> { %v4542_v63 = vpop.f32.mrf.mxu0 }
 0x529   : >> { %v3128_v45 = vpop.f32.mrf.mxu0 }
 0x52a   : >> { %v1754_v40 = vpop.xlane.xlu1 %1753 }
 0x52b   : >> { %v4544_v32 = vpop.f32.mrf.mxu0  ;;  %3493 = vrcp.f32 %v1754_v40 }
 0x52c   : >> { %3495 = vrcp.f32 %v1041_v18 }
 0x52d   : >> { %v3131_v54 = vpop.f32.mrf.mxu0  ;;  %3497 = vrcp.f32 %v1405_v61 }
 0x52e   : >> { %v1757_v50 = vpop.xlane.xlu1 %1756  ;;  %v3490_v54 = vpop.eup %3489 }
 0x52f   : >> { %v4546_v39 = vpop.f32.mrf.mxu0  ;;  %3499 = vrcp.f32 %v1757_v50  ;;  %v1064_v61 = vmul.f32 %v3490_v54, %v4394_v20 }
 0x531   : >> { %v3134_v25 = vpop.f32.mrf.mxu0 }
 0x532   : >> { %v1760_v8 = vpop.xlane.xlu1 %1759  ;;  %v3492_v25 = vpop.eup %3491 }
 0x533   : >> { %v4548_v49 = vpop.f32.mrf.mxu0 }
 0x535   : >> { %v3137_v53 = vpop.f32.mrf.mxu0 }
 0x536   : >> { %v1763_v10 = vpop.xlane.xlu1 %1762  ;;  %v1425_v53 = vmul.f32 %v3488_v7, %v4538_v56 }
 0x538   : >> { %v3494_v46 = vpop.eup %3493 }
 0x53a   : >> { %v1766_v45 = vpop.xlane.xlu1 %1765 }
 0x53f   : >> { %v2109_v24 = vpop.xlane.xlu0 %2108 }
 0x540   : >> { %3501 = vrcp.f32 %v2109_v24 }
 0x541   : >> { %3503 = vrcp.f32 %v1044_v34  ;;  %v3496_v34 = vpop.eup %3495 }
 0x542   : >> { %3505 = vrcp.f32 %v1408_v33 }
 0x543   : >> { %3507 = vrcp.f32 %v1760_v8 }
 0x55c   : >> { %v4550_v28 = vpop.f32.mrf.mxu0 }
 0x55e   : >> { %v3140_v16 = vpop.f32.mrf.mxu0 }
 0x560   : >> { %v1718_v41 = vpop.f32.mrf.mxu0 }
 0x561   : >> { %v1780_v16 = vmul.f32 %v3494_v46, %v1718_v41 }
 0x562   : >> { %v3180_v58 = vpop.f32.mrf.mxu0 }
 0x563   : >> { %v2112_v52 = vpop.xlane.xlu0 %2111  ;;  %v3498_v58 = vpop.eup %3497 }
 0x564   : >> { %v4552_v62 = vpop.f32.mrf.mxu0  ;;  %3509 = vrcp.f32 %v2112_v52  ;;  %v3500_v33 = vpop.eup %3499  ;;  %v1427_v50 = vmul.f32 %v3498_v58, %v4542_v63 }
 0x565   : >> { %3511 = vrcp.f32 %v1047_v31  ;;  %v3502_v56 = vpop.eup %3501  ;;  %v1781_v20 = vmul.f32 %v3500_v33, %v4552_v62  ;;  %v4575_v62 = vld [vmem:[%s3858_s16 + $0x3] ss:$0 sm:$0xff] }
 0x566   : >> { %v3183_v59 = vpop.f32.mrf.mxu0  ;;  %3513 = vrcp.f32 %v1411_v11  ;;  %v1426_v11 = vmul.f32 %v3492_v25, %v4540_v30 }
 0x567   : >> { %v2115_v9 = vpop.xlane.xlu0 %2114  ;;  %3515 = vrcp.f32 %v1763_v10  ;;  %v1432_v59 = vadd.f32 %v1425_v53, %v1064_v61 }
 0x568   : >> { %v4554_v48 = vpop.f32.mrf.mxu0  ;;  %3517 = vrcp.f32 %v2115_v9 }
 0x569   : >> { %3519 = vrcp.f32 %v1050_v23  ;;  %v1065_v23 = vmul.f32 %v3496_v34, %v4402_v14 }
 0x56a   : >> { %v3186_v44 = vpop.f32.mrf.mxu0  ;;  %3521 = vrcp.f32 %v1414_v51  ;;  %v1787_v51 = vadd.f32 %v1780_v16, %v1432_v59 }
 0x56b   : >> { %v2118_v27 = vpop.xlane.xlu0 %2117  ;;  %3523 = vrcp.f32 %v1766_v45  ;;  %v1769_v44 = vpop.xlane.xlu1 %1768  ;;  %v1433_v30 = vadd.f32 %v1426_v11, %v1065_v23 }
 0x56c   : >> { %v4556_v21 = vpop.f32.mrf.mxu0  ;;  %3525 = vrcp.f32 %v2118_v27 }
 0x56d   : >> { %3527 = vrcp.f32 %v1053_v42  ;;  %v1788_v10 = vadd.f32 %v1781_v20, %v1433_v30 }
 0x56e   : >> { %v3189_v17 = vpop.f32.mrf.mxu0  ;;  %3529 = vrcp.f32 %v1056_v15 }
 0x56f   : >> { %v2121_v18 = vpop.xlane.xlu0 %2120  ;;  %3531 = vrcp.f32 %v1769_v44  ;;  %v1772_v52 = vpop.xlane.xlu1 %1771 }
 0x570   : >> { %v4558_v29 = vpop.f32.mrf.mxu0  ;;  %3533 = vrcp.f32 %v2121_v18 }
 0x572   : >> { %v3192_v36 = vpop.f32.mrf.mxu0 }
 0x573   : >> { %v3504_v36 = vpop.eup %3503  ;;  %v2124_v40 = vpop.xlane.xlu0 %2123  ;;  %3535 = vrcp.f32 %v4560_v37 }
 0x574   : >> { %v4562_v19 = vpop.f32.mrf.mxu0  ;;  %v1066_v8 = vmul.f32 %v3504_v36, %v4412_v60 }
 0x576   : >> { %v3195_v55 = vpop.f32.mrf.mxu0  ;;  %v1434_v46 = vadd.f32 %v1427_v50, %v1066_v8 }
 0x577   : >> { %v3506_v55 = vpop.eup %3505  ;;  %3537 = vrcp.f32 %v1772_v52  ;;  %v2127_v61 = vpop.xlane.xlu0 %2126 }
 0x578   : >> { %v3508_v24 = vpop.eup %3507  ;;  %v1428_v63 = vmul.f32 %v3506_v55, %v4544_v32  ;;  %3539 = vrcp.f32 %v2124_v40 }
 0x579   : >> { %v3510_v14 = vpop.eup %3509  ;;  %v1782_v27 = vmul.f32 %v3508_v24, %v4554_v48  ;;  %3541 = vrcp.f32 %v2127_v61 }
 0x57a   : >> { %v3512_v9 = vpop.eup %3511 }
 0x57b   : >> { %v3514_v54 = vpop.eup %3513  ;;  %v1067_v34 = vmul.f32 %v3512_v9, %v4422_v22  ;;  %v1789_v58 = vadd.f32 %v1782_v27, %v1434_v46 }
 0x57c   : >> { %v3516_v53 = vpop.eup %3515  ;;  %v1429_v23 = vmul.f32 %v3514_v54, %v4546_v39 }
 0x57d   : >> { %v3518_v18 = vpop.eup %3517  ;;  %v1783_v48 = vmul.f32 %v3516_v53, %v4556_v21  ;;  %v1435_v11 = vadd.f32 %v1428_v63, %v1067_v34 }
 0x57e   : >> { %v3520_v16 = vpop.eup %3519 }
 0x57f   : >> { %v3522_v59 = vpop.eup %3521  ;;  %v1068_v36 = vmul.f32 %v3520_v16, %v4429_v38 }
 0x580   : >> { %v1430_v24 = vmul.f32 %v3522_v59, %v4548_v49 }
 0x581   : >> { %v1436_v52 = vadd.f32 %v1429_v23, %v1068_v36 }
 0x595   : >> { %v4565_v57 = vpop.f32.mrf.mxu0 }
 0x597   : >> { %v3198_v31 = vpop.f32.mrf.mxu0 }
 0x599   : >> { %v2073_v17 = vpop.f32.mrf.mxu0 }
 0x59a   : >> { %v2135_v41 = vmul.f32 %v3502_v56, %v2073_v17  ;;  %v3524_v56 = vpop.eup %3523 }
 0x59b   : >> { %v3238_v47 = vpop.f32.mrf.mxu0  ;;  %v3526_v17 = vpop.eup %3525 }
 0x59c   : >> { %v2142_v42 = vadd.f32 %v2135_v41, %v1787_v51  ;;  %v3528_v20 = vpop.eup %3527  ;;  %v1784_v41 = vmul.f32 %v3524_v56, %v4558_v29 }
 0x59d   : >> { %v2078_v15 = vpop.f32.mrf.mxu0  ;;  %v3530_v39 = vpop.eup %3529  ;;  %v1069_v29 = vmul.f32 %v3528_v20, %v4435_v26 }
 0x59e   : >> { %v2149_v7 = vadd.f32 %v3653_v0, %v2142_v42  ;;  %v2136_v45 = vmul.f32 %v3510_v14, %v2078_v15  ;;  %v3532_v50 = vpop.eup %3531  ;;  %v1791_v9 = vadd.f32 %v1784_v41, %v1436_v52  ;;  %v1070_v53 = vmul.f32 %v3530_v39, %v4439_v43 }
 0x59f   : >> { %v3241_v25 = vpop.f32.mrf.mxu0  ;;  %v3534_v14 = vpop.eup %3533 }
 0x5a0   : >> { %v2143_v60 = vadd.f32 %v2136_v45, %v1788_v10  ;;  %v4581_v37 = vadd.f32 %v4575_v62, %v2149_v7  ;;  %v3536_v15 = vpop.eup %3535  ;;  %v1437_v7 = vadd.f32 %v1430_v24, %v1069_v29 }
 0x5a1   : >> { %v2083_v0 = vpop.f32.mrf.mxu0  ;;  %v3538_v54 = vpop.eup %3537  ;;  %v1431_v63 = vmul.f32 %v3536_v15, %v4550_v28 }
 0x5a2   : >> { %v2150_v32 = vadd.f32 %v3649_v1, %v2143_v60  ;;  %v2137_v31 = vmul.f32 %v3518_v18, %v2083_v0  ;;  %v2170_v33 = vsel %vm264_vm0, %v4581_v37, 0.0  ;;  %v1790_v1 = vadd.f32 %v1783_v48, %v1435_v11 }
 0x5a3   : >> { %v3244_v44 = vpop.f32.mrf.mxu0  ;;  %2171 = vadd.xlane.f32.xlu1 %v2170_v33  ;;  %v1438_v28 = vadd.f32 %v1431_v63, %v1070_v53 }
 0x5a4   : >> { %v2144_v22 = vadd.f32 %v2137_v31, %v1789_v58  ;;  %v4590_v21 = vadd.f32 %v4575_v62, %v2150_v32 }
 0x5a5   : >> { %v2088_v51 = vpop.f32.mrf.mxu0 }
 0x5a6   : >> { %v2151_v55 = vadd.f32 %v3645_v2, %v2144_v22  ;;  %v2138_v40 = vmul.f32 %v3526_v17, %v2088_v51  ;;  %v2173_v47 = vsel %vm264_vm0, %v4590_v21, 0.0  ;;  %v1785_v2 = vmul.f32 %v3532_v50, %v4562_v19  ;;  %v3540_v19 = vpop.eup %3539  ;;  %v2286_v22 = vld [vmem:[%s3840_s11 + $0x78] sm:$0xff] }
 0x5a7   : >> { %v3247_v30 = vpop.f32.mrf.mxu0  ;;  %2174 = vadd.xlane.f32.xlu0 %v2173_v47  ;;  %v3542_v58 = vpop.eup %3541  ;;  %3258 = vmatpush3.msra.mxu1 %v2286_v22 }
 0x5a8   : >> { %v2145_v42 = vadd.f32 %v2138_v40, %v1790_v1  ;;  %v4599_v38 = vadd.f32 %v4575_v62, %v2151_v55  ;;  %v1792_v46 = vadd.f32 %v1785_v2, %v1437_v7  ;;  %3259 = vmatprep.subr.mxu1 %v4809_v35 }
 0x5a9   : >> { %v2093_v8 = vpop.f32.mrf.mxu0 }
 0x5aa   : >> { %v2152_v10 = vadd.f32 %v3641_v3, %v2145_v42  ;;  %v2139_v27 = vmul.f32 %v3534_v14, %v2093_v8  ;;  %v2176_v49 = vsel %vm264_vm0, %v4599_v38, 0.0  ;;  %v1786_v3 = vmul.f32 %v3538_v54, %v4565_v57 }
 0x5ab   : >> { %v3250_v45 = vpop.f32.mrf.mxu0  ;;  %2177 = vadd.xlane.f32.xlu1 %v2176_v49 }
 0x5ac   : >> { %v2146_v25 = vadd.f32 %v2139_v27, %v1791_v9  ;;  %v4608_v26 = vadd.f32 %v4575_v62, %v2152_v10  ;;  %v1793_v32 = vadd.f32 %v1786_v3, %v1438_v28  ;;  %v2285_v3 = vld [vmem:[%s3840_s11 + $0x70] sm:$0xff]  ;;  %v2425_v28 = vld [vmem:[%s3840_s11 + $0xa8] sm:$0xff] }
 0x5ad   : >> { %v2098_v60 = vpop.f32.mrf.mxu0  ;;  %3260 = vmatpush3.msra.mxu1 %v2285_v3 }
 0x5ae   : >> { %v2153_v18 = vadd.f32 %v3637_v4, %v2146_v25  ;;  %v2140_v34 = vmul.f32 %v3540_v19, %v2098_v60  ;;  %v2179_v48 = vsel %vm264_vm0, %v4608_v26, 0.0  ;;  %3261 = vmatprep.subr.mxu1 %v4809_v35 }
 0x5af   : >> { %v3253_v61 = vpop.f32.mrf.mxu0  ;;  %2180 = vadd.xlane.f32.xlu0 %v2179_v48  ;;  %v2427_v48 = vld [vmem:[%s3840_s11 + $0xb8] sm:$0xff] }
 0x5b0   : >> { %v2147_v0 = vadd.f32 %v2140_v34, %v1792_v46  ;;  %v4616_v16 = vadd.f32 %v4575_v62, %v2153_v18  ;;  %v2284_v18 = vld [vmem:[%s3840_s11 + $0x68] sm:$0xff]  ;;  %v2283_v34 = vld [vmem:[%s3840_s11 + $0x60] sm:$0xff]  ;;  %v2426_v61 = vld [vmem:[%s3840_s11 + $0xb0] sm:$0xff]  ;;  %3287 = vmatpush3.msra.mxu0 %v2427_v48 }
 0x5b1   : >> { %v2103_v43 = vpop.f32.mrf.mxu0  ;;  %3262 = vmatpush3.msra.mxu1 %v2284_v18  ;;  %3288 = vmatprep.subr.mxu0 %v4809_v35 }
 0x5b2   : >> { %v2154_v31 = vadd.f32 %v3633_v5, %v2147_v0  ;;  %v2141_v57 = vmul.f32 %v3542_v58, %v2103_v43  ;;  %v2182_v4 = vsel %vm264_vm0, %v4616_v16, 0.0  ;;  %3263 = vmatprep.subr.mxu1 %v4809_v35  ;;  %3289 = vmatpush3.msra.mxu0 %v2426_v61  ;;  %v2424_v0 = vld [vmem:[%s3840_s11 + $0xa0] sm:$0xff]  ;;  %v2423_v58 = vld [vmem:[%s3840_s11 + $0x98] sm:$0xff]  ;;  %v2422_v43 = vld [vmem:[%s3840_s11 + $0x90] sm:$0xff] }
 0x5b3   : >> { %v3256_v33 = vpop.f32.mrf.mxu0  ;;  %2183 = vadd.xlane.f32.xlu1 %v2182_v4  ;;  %3264 = vmatpush3.msra.mxu1 %v2283_v34 }
 0x5b4   : >> { %v2148_v59 = vadd.f32 %v2141_v57, %v1793_v32  ;;  %v4622_v11 = vadd.f32 %v4575_v62, %v2154_v31  ;;  %3290 = vmatprep.subr.mxu0 %v4809_v35  ;;  %v2421_v32 = vld [vmem:[%s3840_s11 + $0x88] sm:$0xff] }
 0x5b5   : >> { %3291 = vmatpush3.msra.mxu0 %v2425_v28 }
 0x5b6   : >> { %v2155_v44 = vadd.f32 %v3629_v6, %v2148_v59  ;;  %v2185_v56 = vsel %vm264_vm0, %v4622_v11, 0.0  ;;  %3292 = vmatprep.subr.mxu0 %v4809_v35 }
 0x5b7   : >> { %2186 = vadd.xlane.f32.xlu0 %v2185_v56  ;;  %3293 = vmatpush3.msra.mxu0 %v2424_v0 }
 0x5b8   : >> { %v4628_v23 = vadd.f32 %v4575_v62, %v2155_v44  ;;  %3294 = vmatprep.subr.mxu0 %v4809_v35 }
 0x5b9   : >> { %3295 = vmatpush3.msra.mxu0 %v2423_v58 }
 0x5ba   : >> { %v2188_v5 = vsel %vm283_vm1, %v4628_v23, 0.0  ;;  %3296 = vmatprep.subr.mxu0 %v4809_v35 }
 0x5bb   : >> { %2189 = vadd.xlane.f32.xlu1 %v2188_v5  ;;  %3297 = vmatpush3.msra.mxu0 %v2422_v43 }
 0x5bc   : >> { %3298 = vmatprep.subr.mxu0 %v4809_v35 }
 0x5bd   : >> { %3299 = vmatpush3.msra.mxu0 %v2421_v32  ;;  %v2782_v32 = vld [vmem:[%s3858_s16 + $0x6] ss:$0 sm:$0xff] }
 0x5be   : >> { %3300 = vmatprep.subr.mxu0 %v4809_v35 }
 0x62c   : >> { %v2172_v17 = vpop.xlane.xlu1 %2171 }
 0x62d   : >> { %v2191_v36 = vmul.f32 0.03125, %v2172_v17 }
 0x62f   : >> { %v4635_v1 = vsub.f32 %v4581_v37, %v2191_v36 }
 0x630   : >> { %v2175_v6 = vpop.xlane.xlu0 %2174 }
 0x631   : >> { %v2192_v51 = vmul.f32 0.03125, %v2175_v6  ;;  %v2205_v20 = vmul.f32 %v4635_v1, %v4635_v1 }
 0x633   : >> { %v4640_v62 = vsub.f32 %v4590_v21, %v2192_v51  ;;  %v2212_v41 = vsel %vm264_vm0, %v2205_v20, 0.0 }
 0x634   : >> { %2213 = vadd.xlane.f32.xlu0 %v2212_v41  ;;  %v2178_v55 = vpop.xlane.xlu1 %2177 }
 0x635   : >> { %v2193_v40 = vmul.f32 0.03125, %v2178_v55  ;;  %v2206_v47 = vmul.f32 %v4640_v62, %v4640_v62  ;;  %v2780_v55 = vld [vmem:[%s3858_s16 + $0x4] ss:$0 sm:$0xff] }
 0x637   : >> { %v4646_v39 = vsub.f32 %v4599_v38, %v2193_v40  ;;  %v2215_v24 = vsel %vm264_vm0, %v2206_v47, 0.0 }
 0x638   : >> { %v2181_v30 = vpop.xlane.xlu0 %2180  ;;  %2216 = vadd.xlane.f32.xlu1 %v2215_v24 }
 0x639   : >> { %v2194_v50 = vmul.f32 0.03125, %v2181_v30  ;;  %v2207_v52 = vmul.f32 %v4646_v39, %v4646_v39  ;;  %v2781_v30 = vld [vmem:[%s3858_s16 + $0x5] ss:$0 sm:$0xff] }
 0x63b   : >> { %v4652_v42 = vsub.f32 %v4608_v26, %v2194_v50  ;;  %v2218_v14 = vsel %vm264_vm0, %v2207_v52, 0.0 }
 0x63c   : >> { %2219 = vadd.xlane.f32.xlu0 %v2218_v14  ;;  %v2184_v29 = vpop.xlane.xlu1 %2183 }
 0x63d   : >> { %v2195_v2 = vmul.f32 0.03125, %v2184_v29  ;;  %v2208_v8 = vmul.f32 %v4652_v42, %v4652_v42 }
 0x63f   : >> { %v4658_v15 = vsub.f32 %v4616_v16, %v2195_v2  ;;  %v2221_v9 = vsel %vm264_vm0, %v2208_v8, 0.0 }
 0x640   : >> { %v2187_v10 = vpop.xlane.xlu0 %2186  ;;  %2222 = vadd.xlane.f32.xlu1 %v2221_v9 }
 0x641   : >> { %v2196_v27 = vmul.f32 0.03125, %v2187_v10  ;;  %v2209_v49 = vmul.f32 %v4658_v15, %v4658_v15 }
 0x643   : >> { %v4664_v7 = vsub.f32 %v4622_v11, %v2196_v27  ;;  %v2224_v45 = vsel %vm264_vm0, %v2209_v49, 0.0 }
 0x644   : >> { %2225 = vadd.xlane.f32.xlu0 %v2224_v45  ;;  %v2190_v54 = vpop.xlane.xlu1 %2189 }
 0x645   : >> { %v2197_v63 = vmul.f32 0.03125, %v2190_v54  ;;  %v2210_v25 = vmul.f32 %v4664_v7, %v4664_v7 }
 0x647   : >> { %v4670_v19 = vsub.f32 %v4628_v23, %v2197_v63  ;;  %v2227_v53 = vsel %vm264_vm0, %v2210_v25, 0.0 }
 0x648   : >> { %2228 = vadd.xlane.f32.xlu1 %v2227_v53 }
 0x649   : >> { %v2211_v46 = vmul.f32 %v4670_v19, %v4670_v19 }
 0x64b   : >> { %v2230_v60 = vsel %vm283_vm1, %v2211_v46, 0.0 }
 0x64c   : >> { %2231 = vadd.xlane.f32.xlu0 %v2230_v60 }
 0x6bd   : >> { %v2214_v31 = vpop.xlane.xlu0 %2213 }
 0x6be   : >> { %v2233_v57 = vmul.f32 0.03125, %v2214_v31 }
 0x6c0   : >> { %v2240_v4 = vadd.f32 1e-05, %v2233_v57 }
 0x6c1   : >> { %v2217_v33 = vpop.xlane.xlu1 %2216 }
 0x6c2   : >> { %3543 = vrsqrt.f32 %v2240_v4  ;;  %v2234_v59 = vmul.f32 0.03125, %v2217_v33 }
 0x6c4   : >> { %v2241_v44 = vadd.f32 1e-05, %v2234_v59 }
 0x6c5   : >> { %v2220_v56 = vpop.xlane.xlu0 %2219 }
 0x6c6   : >> { %3545 = vrsqrt.f32 %v2241_v44  ;;  %v2235_v5 = vmul.f32 0.03125, %v2220_v56 }
 0x6c8   : >> { %v2242_v22 = vadd.f32 1e-05, %v2235_v5 }
 0x6c9   : >> { %v2223_v17 = vpop.xlane.xlu1 %2222 }
 0x6ca   : >> { %3547 = vrsqrt.f32 %v2242_v22  ;;  %v2236_v36 = vmul.f32 0.03125, %v2223_v17 }
 0x6cc   : >> { %v2243_v6 = vadd.f32 1e-05, %v2236_v36 }
 0x6cd   : >> { %v2226_v51 = vpop.xlane.xlu0 %2225 }
 0x6ce   : >> { %3549 = vrsqrt.f32 %v2243_v6  ;;  %v2237_v20 = vmul.f32 0.03125, %v2226_v51 }
 0x6cf   : >> { %v3544_v41 = vpop.eup %3543 }
 0x6d0   : >> { %v2254_v40 = vmul.f32 %v3544_v41, %v4635_v1  ;;  %v2244_v47 = vadd.f32 1e-05, %v2237_v20 }
 0x6d1   : >> { %v2229_v24 = vpop.xlane.xlu1 %2228 }
 0x6d2   : >> { %v2265_v50 = vmul.f32 %v2780_v55, %v2254_v40  ;;  %3551 = vrsqrt.f32 %v2244_v47  ;;  %v2238_v52 = vmul.f32 0.03125, %v2229_v24 }
 0x6d3   : >> { %v3546_v14 = vpop.eup %3545 }
 0x6d4   : >> { %v2245_v29 = vadd.f32 1e-05, %v2238_v52  ;;  %v2276_v2 = vadd.f32 %v2781_v30, %v2265_v50  ;;  %v2255_v8 = vmul.f32 %v3546_v14, %v4640_v62 }
 0x6d5   : >> { %v2232_v9 = vpop.xlane.xlu0 %2231 }
 0x6d6   : >> { %3553 = vrsqrt.f32 %v2245_v29  ;;  %v2239_v10 = vmul.f32 0.03125, %v2232_v9  ;;  %3266 = vmatmul.mubr.msk.f32.vlgmr.msra.gmra.mxu1 %vm264_vm0, %v2276_v2  ;;  %v2266_v27 = vmul.f32 %v2780_v55, %v2255_v8 }
 0x6d7   : >> { %v3548_v49 = vpop.eup %3547  ;;  %3268 = vmatprep.mubr.msk.f32.mxu1 %vm3663_vm2, %v4809_v35 }
 0x6d8   : >> { %v2246_v1 = vadd.f32 1e-05, %v2239_v10  ;;  %v2277_v45 = vadd.f32 %v2781_v30, %v2266_v27  ;;  %v2256_v54 = vmul.f32 %v3548_v49, %v4646_v39  ;;  %v2790_v10 = vld [vmem:[%s3858_s16 + $0x7] ss:$0 sm:$0xff] }
 0x6da   : >> { %3555 = vrsqrt.f32 %v2246_v1  ;;  %3269 = vmatmul.mubr.msk.f32.gmra.mxu1 %vm264_vm0, %v2277_v45  ;;  %v2267_v63 = vmul.f32 %v2780_v55, %v2256_v54 }
 0x6db   : >> { %v3550_v25 = vpop.eup %3549  ;;  %3271 = vmatprep.mubr.msk.f32.mxu1 %vm3663_vm2, %v4809_v35 }
 0x6dc   : >> { %v2278_v62 = vadd.f32 %v2781_v30, %v2267_v63  ;;  %v2257_v53 = vmul.f32 %v3550_v25, %v4652_v42 }
 0x6de   : >> { %3272 = vmatmul.mubr.msk.f32.gmra.mxu1 %vm264_vm0, %v2278_v62  ;;  %v2268_v46 = vmul.f32 %v2780_v55, %v2257_v53 }
 0x6df   : >> { %v3552_v60 = vpop.eup %3551  ;;  %3274 = vmatprep.mubr.msk.f32.mxu1 %vm3663_vm2, %v4809_v35 }
 0x6e0   : >> { %v2279_v3 = vadd.f32 %v2781_v30, %v2268_v46  ;;  %v2258_v39 = vmul.f32 %v3552_v60, %v4658_v15 }
 0x6e2   : >> { %3275 = vmatmul.mubr.msk.f32.gmra.mxu1 %vm264_vm0, %v2279_v3  ;;  %v2269_v18 = vmul.f32 %v2780_v55, %v2258_v39 }
 0x6e3   : >> { %v3554_v34 = vpop.eup %3553  ;;  %3277 = vmatprep.mubr.msk.f32.mxu1 %vm3663_vm2, %v4809_v35 }
 0x6e4   : >> { %v2280_v42 = vadd.f32 %v2781_v30, %v2269_v18  ;;  %v2259_v48 = vmul.f32 %v3554_v34, %v4664_v7  ;;  %v2420_v7 = vld [vmem:[%s3840_s11 + $0x80] sm:$0xff] }
 0x6e5   : >> { %3301 = vmatpush3.msra.mxu0 %v2420_v7 }
 0x6e6   : >> { %3278 = vmatmul.mubr.msk.f32.gmra.mxu1 %vm264_vm0, %v2280_v42  ;;  %v2270_v61 = vmul.f32 %v2780_v55, %v2259_v48 }
 0x6e7   : >> { %v3556_v28 = vpop.eup %3555  ;;  %3280 = vmatprep.mubr.msk.f32.mxu1 %vm3663_vm2, %v4809_v35 }
 0x6e8   : >> { %v2281_v15 = vadd.f32 %v2781_v30, %v2270_v61  ;;  %v2260_v0 = vmul.f32 %v3556_v28, %v4670_v19 }
 0x6ea   : >> { %3281 = vmatmul.mubr.msk.f32.gmra.mxu1 %vm264_vm0, %v2281_v15  ;;  %v2271_v58 = vmul.f32 %v2780_v55, %v2260_v0 }
 0x6eb   : >> { %3283 = vmatprep.mubr.msk.f32.mxu1 %vm3663_vm2, %v4809_v35 }
 0x6ec   : >> { %v2282_v43 = vadd.f32 %v2781_v30, %v2271_v58 }
 0x6ee   : >> { %3284 = vmatmul.mubr.msk.f32.gmra.mxu1 %vm264_vm0, %v2282_v43 }
 0x796   : >> { %v2379_v31 = vpop.f32.mrf.mxu1 }
 0x797   : >> { %v2380_v57 = vadd.f32 %v2782_v32, %v2379_v31 }
 0x798   : >> { %v3267_v4 = vpop.f32.mrf.mxu1 }
 0x799   : >> { %v2413_v33 = vmax.f32 %v2380_v57, 0.0 }
 0x79a   : >> { %v2384_v59 = vpop.f32.mrf.mxu1 }
 0x79b   : >> { %v2385_v44 = vadd.f32 %v2782_v32, %v2384_v59  ;;  %3303 = vmatmul.mubr.msk.f32.vlgmr.msra.gmra.mxu0 %vm2433_vm7, %v2413_v33 }
 0x79c   : >> { %v3270_v19 = vpop.f32.mrf.mxu1  ;;  %3305 = vmatprep.mubr.msk.f32.mxu0 %vm3663_vm2, %v4809_v35 }
 0x79d   : >> { %v2414_v56 = vmax.f32 %v2385_v44, 0.0 }
 0x79e   : >> { %v2389_v5 = vpop.f32.mrf.mxu1 }
 0x79f   : >> { %v2390_v22 = vadd.f32 %v2782_v32, %v2389_v5  ;;  %3306 = vmatmul.mubr.msk.f32.gmra.mxu0 %vm2433_vm7, %v2414_v56 }
 0x7a0   : >> { %v3273_v17 = vpop.f32.mrf.mxu1  ;;  %3308 = vmatprep.mubr.msk.f32.mxu0 %vm3663_vm2, %v4809_v35 }
 0x7a1   : >> { %v2415_v36 = vmax.f32 %v2390_v22, 0.0 }
 0x7a2   : >> { %v2394_v6 = vpop.f32.mrf.mxu1 }
 0x7a3   : >> { %v2395_v51 = vadd.f32 %v2782_v32, %v2394_v6  ;;  %3309 = vmatmul.mubr.msk.f32.gmra.mxu0 %vm2433_vm7, %v2415_v36 }
 0x7a4   : >> { %v3276_v20 = vpop.f32.mrf.mxu1  ;;  %3311 = vmatprep.mubr.msk.f32.mxu0 %vm3663_vm2, %v4809_v35 }
 0x7a5   : >> { %v2416_v41 = vmax.f32 %v2395_v51, 0.0 }
 0x7a6   : >> { %v2399_v55 = vpop.f32.mrf.mxu1 }
 0x7a7   : >> { %v2400_v40 = vadd.f32 %v2782_v32, %v2399_v55  ;;  %3312 = vmatmul.mubr.msk.f32.gmra.mxu0 %vm2433_vm7, %v2416_v41 }
 0x7a8   : >> { %v3279_v47 = vpop.f32.mrf.mxu1  ;;  %3314 = vmatprep.mubr.msk.f32.mxu0 %vm3663_vm2, %v4809_v35 }
 0x7a9   : >> { %v2417_v24 = vmax.f32 %v2400_v40, 0.0 }
 0x7aa   : >> { %v2404_v30 = vpop.f32.mrf.mxu1 }
 0x7ab   : >> { %v2405_v50 = vadd.f32 %v2782_v32, %v2404_v30  ;;  %3315 = vmatmul.mubr.msk.f32.gmra.mxu0 %vm2433_vm7, %v2417_v24 }
 0x7ac   : >> { %v3282_v52 = vpop.f32.mrf.mxu1  ;;  %3317 = vmatprep.mubr.msk.f32.mxu0 %vm3663_vm2, %v4809_v35 }
 0x7ad   : >> { %v2418_v14 = vmax.f32 %v2405_v50, 0.0 }
 0x7ae   : >> { %v2409_v29 = vpop.f32.mrf.mxu1 }
 0x7af   : >> { %v2410_v2 = vadd.f32 %v2782_v32, %v2409_v29  ;;  %3318 = vmatmul.mubr.msk.f32.gmra.mxu0 %vm2433_vm7, %v2418_v14 }
 0x7b0   : >> { %v3285_v8 = vpop.f32.mrf.mxu1  ;;  %3320 = vmatprep.mubr.msk.f32.mxu0 %vm3663_vm2, %v4809_v35 }
 0x7b1   : >> { %v2419_v9 = vmax.f32 %v2410_v2, 0.0 }
 0x7b3   : >> { %3321 = vmatmul.mubr.msk.f32.gmra.mxu0 %vm2433_vm7, %v2419_v9 }
 0x85b   : >> { %v2521_v27 = vpop.f32.mrf.mxu0 }
 0x85c   : >> { %v2522_v49 = vadd.f32 %v2790_v10, %v2521_v27 }
 0x85d   : >> { %v3304_v1 = vpop.f32.mrf.mxu0 }
 0x85e   : >> { %v2555_v45 = vadd.f32 %v2522_v49, %v4581_v37  }
 0x85f   : >> { %v2526_v54 = vpop.f32.mrf.mxu0 }
 0x860   : >> { %v2527_v63 = vadd.f32 %v2790_v10, %v2526_v54  ;;  %2563 = vst.msk [vmem:[%s3726_s8] sm:$0xff] (%p249_p1), %vm264_vm0, %v2555_v45 }
 0x861   : >> { %v3307_v25 = vpop.f32.mrf.mxu0 }
 0x862   : >> { %v2556_v62 = vadd.f32 %v2527_v63, %v4590_v21  }
 0x863   : >> { %v2531_v53 = vpop.f32.mrf.mxu0 }
 0x864   : >> { %v2532_v46 = vadd.f32 %v2790_v10, %v2531_v53  ;;  %v4815_v1 = vmov %v2556_v62  ;;  %2564 = vst.msk [vmem:[%s3726_s8 + $0x8] sm:$0xff] (%p249_p1), %vm264_vm0, %v2556_v62 }
 0x865   : >> { %v3310_v60 = vpop.f32.mrf.mxu0 }
 0x866   : >> { %v2557_v39 = vadd.f32 %v2532_v46, %v4599_v38  }
 0x867   : >> { %v2536_v35 = vpop.f32.mrf.mxu0 }
 0x868   : >> { %v2537_v3 = vadd.f32 %v2790_v10, %v2536_v35  ;;  %v4814_v2 = vmov %v2557_v39  ;;  %2565 = vst.msk [vmem:[%s3726_s8 + $0x10] sm:$0xff] (%p249_p1), %vm264_vm0, %v2557_v39 }
 0x869   : >> { %v3313_v18 = vpop.f32.mrf.mxu0 }
 0x86a   : >> { %v2558_v34 = vadd.f32 %v2537_v3, %v4608_v26  }
 0x86b   : >> { %v2541_v42 = vpop.f32.mrf.mxu0 }
 0x86c   : >> { %v2542_v48 = vadd.f32 %v2790_v10, %v2541_v42  ;;  %v4813_v3 = vmov %v2558_v34  ;;  %2566 = vst.msk [vmem:[%s3726_s8 + $0x18] sm:$0xff] (%p249_p1), %vm264_vm0, %v2558_v34 }
 0x86d   : >> { %v3316_v61 = vpop.f32.mrf.mxu0 }
 0x86e   : >> { %v2559_v37 = vadd.f32 %v2542_v48, %v4616_v16  }
 0x86f   : >> { %v2546_v28 = vpop.f32.mrf.mxu0 }
 0x870   : >> { %v2547_v15 = vadd.f32 %v2790_v10, %v2546_v28  ;;  %v4812_v4 = vmov %v2559_v37  ;;  %2567 = vst.msk [vmem:[%s3726_s8 + $0x20] sm:$0xff] (%p249_p1), %vm264_vm0, %v2559_v37 }
 0x871   : >> { %v3319_v0 = vpop.f32.mrf.mxu0 }
 0x872   : >> { %v2560_v21 = vadd.f32 %v2547_v15, %v4622_v11   ;;  %v4816_v0 = vmov %v2555_v45 }
 0x873   : >> { %v2551_v58 = vpop.f32.mrf.mxu0 }
 0x874   : >> { %v2552_v43 = vadd.f32 %v2790_v10, %v2551_v58  ;;  %v4811_v5 = vmov %v2560_v21  ;;  %251 = sbr.rel (!%p249_p1) target bundleno = 39 (0x27), region = 83  ;;  %2568 = vst.msk [vmem:[%s3726_s8 + $0x28] sm:$0xff] (%p249_p1), %vm264_vm0, %v2560_v21 }
 0x875   : >> { %v3322_v7 = vpop.f32.mrf.mxu0 }
 0x876   : >> { %v2561_v38 = vadd.f32 %v2552_v43, %v4628_v23  }
 0x878   : >> { %v4810_v6 = vmov %v2561_v38  ;;  %2570 = vst.msk [vmem:[%s3726_s8 + $0x30] sm:$0x3] (%p249_p1), %vm283_vm1, %v2561_v38 }
 0x879 PF: > { %s15_s15 = sadd.s32 1, %s3625_s15  }
 0x87a   : > { %p12_p2 = scmp.ge.s32.totalorder %s15_s15, 4  }
 0x87c   :  { %14 = sbr.rel (!%p12_p2) target bundleno = 1 (0x1), region = 94 }
 0x881   :  { %2592 = vsyncpa [#allocation3], 1 }
 0x882   :  { %2594 = vsyncpa [#allocation3 + $0x1], 1 }

</bundles_post_ra>
